<compile_context>
chip_gen: v5e
topology: v5e:2x2
jax: 0.10.0
libtpu: 0.0.40
codegen_flags: <defaults>
</compile_context>

<pallas_src>
import functools

import jax
import jax.numpy as jnp
from jax.experimental import pallas as pl
from jax.experimental.pallas import tpu as pltpu

# ---------------- small synthetic BERT config ----------------
VOCAB = 100
MAX_POS = 16
TYPE_VOCAB = 2
HIDDEN = 32
NUM_HEADS = 2
HEAD_DIM = HIDDEN // NUM_HEADS
INTERMEDIATE = 64
NUM_LAYERS = 2
NUM_LABELS = 3
LN_EPS = 1e-12

BATCH = 2
SEQ = 8


# ---------------- in-kernel helpers (traced into the Pallas kernel) ----------------
def _layernorm(h, gamma, beta, eps):
    mu = jnp.mean(h, axis=-1, keepdims=True)
    var = jnp.mean((h - mu) * (h - mu), axis=-1, keepdims=True)
    return (h - mu) * jax.lax.rsqrt(var + eps) * gamma + beta


def _gelu(y):
    # TODO(synk): HF BERT default is exact erf-GELU; tanh approximation used here
    # for robust Mosaic lowering (deviation ~1e-3 on these synthetic weights).
    return 0.5 * y * (1.0 + jnp.tanh(0.7978845608028654 * (y + 0.044715 * y * y * y)))


# ---------------- the fused whole-model kernel ----------------
def _bert_kernel(x_ref, mask_ref, eln_ref,
                 wqkv_ref, bqkv_ref, wo_ref, vecs_ref,
                 wi_ref, bi_ref, wo2_ref,
                 pw_ref, pb_ref, cw_ref, cb_ref,
                 out_ref, *, scale, eps):
    """One grid step == one batch example; everything stays in VMEM/vregs."""
    x = x_ref[0]            # [S, H]  summed (word+pos+type) embeddings
    bias = mask_ref[0]      # [1, S]  additive attention-mask bias

    # embedding LayerNorm (no residual input)
    x = _layernorm(x, eln_ref[0], eln_ref[1], eps)

    for l in range(NUM_LAYERS):
        # ---- self-attention: all heads + output projection, fused ----
        attn = jnp.zeros_like(x)
        for h in range(NUM_HEADS):
            q = jnp.dot(x, wqkv_ref[l, 0, h],
                        preferred_element_type=jnp.float32) + bqkv_ref[l, 0, h]
            k = jnp.dot(x, wqkv_ref[l, 1, h],
                        preferred_element_type=jnp.float32) + bqkv_ref[l, 1, h]
            v = jnp.dot(x, wqkv_ref[l, 2, h],
                        preferred_element_type=jnp.float32) + bqkv_ref[l, 2, h]
            s = jnp.dot(q, k.T, preferred_element_type=jnp.float32) * scale + bias
            s = s - jnp.max(s, axis=-1, keepdims=True)
            p = jnp.exp(s)
            p = p * pl.reciprocal(jnp.sum(p, axis=-1, keepdims=True), approx=True)
            ctx = jnp.dot(p, v, preferred_element_type=jnp.float32)            # [S, DH]
            # per-head slice of the output projection, accumulated (== concat @ Wo)
            attn = attn + jnp.dot(ctx, wo_ref[l, h],
                                  preferred_element_type=jnp.float32)
        attn = attn + vecs_ref[l, 0]                                           # + b_o
        x = _layernorm(attn + x, vecs_ref[l, 1], vecs_ref[l, 2], eps)          # add + LN

        # ---- feed-forward: up-proj + GELU + down-proj + add + LN, all in VMEM ----
        inter = _gelu(jnp.dot(x, wi_ref[l],
                              preferred_element_type=jnp.float32) + bi_ref[l])
        ffn = jnp.dot(inter, wo2_ref[l],
                      preferred_element_type=jnp.float32) + vecs_ref[l, 3]
        x = _layernorm(ffn + x, vecs_ref[l, 4], vecs_ref[l, 5], eps)

    # ---- pooler (tanh dense on [CLS]) + classifier head, fused ----
    cls = x[0:1, :]                                                            # [1, H]
    pooled = jnp.tanh(jnp.dot(cls, pw_ref[...],
                              preferred_element_type=jnp.float32) + pb_ref[...])
    out_ref[0] = (jnp.dot(pooled, cw_ref[...],
                          preferred_element_type=jnp.float32) + cb_ref[...])   # [1, NUM_LABELS]


# ---------------- parameter init (deterministic, synthetic) ----------------
def init_params(key):
    # TODO(synk): from_pretrained checkpoint loading has no in-script equivalent;
    # deterministic synthetic weights of the same shapes are used instead.
    def normal(k, shape, scale=0.02):
        return scale * jax.random.normal(k, shape, dtype=jnp.float32)

    keys = iter(jax.random.split(key, 256))
    params = {
        "word_emb": normal(next(keys), (VOCAB, HIDDEN)),
        "pos_emb": normal(next(keys), (MAX_POS, HIDDEN)),
        "type_emb": normal(next(keys), (TYPE_VOCAB, HIDDEN)),
        "emb_ln_g": jnp.ones((HIDDEN,), jnp.float32),
        "emb_ln_b": jnp.zeros((HIDDEN,), jnp.float32),
        "layers": [],
        "pooler_w": normal(next(keys), (HIDDEN, HIDDEN)),
        "pooler_b": jnp.zeros((HIDDEN,), jnp.float32),
        "cls_w": normal(next(keys), (HIDDEN, NUM_LABELS)),
        "cls_b": jnp.zeros((NUM_LABELS,), jnp.float32),
    }
    for _ in range(NUM_LAYERS):
        layer = {
            "wq": normal(next(keys), (HIDDEN, HIDDEN)),
            "bq": jnp.zeros((HIDDEN,), jnp.float32),
            "wk": normal(next(keys), (HIDDEN, HIDDEN)),
            "bk": jnp.zeros((HIDDEN,), jnp.float32),
            "wv": normal(next(keys), (HIDDEN, HIDDEN)),
            "bv": jnp.zeros((HIDDEN,), jnp.float32),
            "wo": normal(next(keys), (HIDDEN, HIDDEN)),
            "bo": jnp.zeros((HIDDEN,), jnp.float32),
            "ln1_g": jnp.ones((HIDDEN,), jnp.float32),
            "ln1_b": jnp.zeros((HIDDEN,), jnp.float32),
            "wi": normal(next(keys), (HIDDEN, INTERMEDIATE)),
            "bi": jnp.zeros((INTERMEDIATE,), jnp.float32),
            "wo2": normal(next(keys), (INTERMEDIATE, HIDDEN)),
            "bo2": jnp.zeros((HIDDEN,), jnp.float32),
            "ln2_g": jnp.ones((HIDDEN,), jnp.float32),
            "ln2_b": jnp.zeros((HIDDEN,), jnp.float32),
        }
        params["layers"].append(layer)
    return params


# ---------------- one-time weight packing (layer-stacked, per-head split) ----------------
def pack_params(params):
    H, NH, DH, I = HIDDEN, NUM_HEADS, HEAD_DIM, INTERMEDIATE
    layers = params["layers"]

    def split_cols(w):      # [H, H] -> [NH, H, DH]   (per-head output columns)
        return w.reshape(H, NH, DH).transpose(1, 0, 2)

    def split_bias(b):      # [H]    -> [NH, 1, DH]
        return b.reshape(NH, DH)[:, None, :]

    wqkv = jnp.stack([jnp.stack([split_cols(l["wq"]),
                                 split_cols(l["wk"]),
                                 split_cols(l["wv"])]) for l in layers])        # [L,3,NH,H,DH]
    bqkv = jnp.stack([jnp.stack([split_bias(l["bq"]),
                                 split_bias(l["bk"]),
                                 split_bias(l["bv"])]) for l in layers])        # [L,3,NH,1,DH]
    wo = jnp.stack([l["wo"].reshape(NH, DH, H) for l in layers])                # [L,NH,DH,H]
    vecs = jnp.stack([jnp.stack([l["bo"].reshape(1, H),
                                 l["ln1_g"].reshape(1, H),
                                 l["ln1_b"].reshape(1, H),
                                 l["bo2"].reshape(1, H),
                                 l["ln2_g"].reshape(1, H),
                                 l["ln2_b"].reshape(1, H)]) for l in layers])   # [L,6,1,H]

    return {
        "word_emb": params["word_emb"],
        "pos_emb": params["pos_emb"],
        "type_emb": params["type_emb"],
        "eln": jnp.stack([params["emb_ln_g"].reshape(1, H),
                          params["emb_ln_b"].reshape(1, H)]),                   # [2,1,H]
        "wqkv": wqkv,
        "bqkv": bqkv,
        "wo": wo,
        "vecs": vecs,
        "wi": jnp.stack([l["wi"] for l in layers]),                             # [L,H,I]
        "bi": jnp.stack([l["bi"].reshape(1, I) for l in layers]),               # [L,1,I]
        "wo2": jnp.stack([l["wo2"] for l in layers]),                           # [L,I,H]
        "pw": params["pooler_w"],
        "pb": params["pooler_b"].reshape(1, H),
        "cw": params["cls_w"],
        "cb": params["cls_b"].reshape(1, NUM_LABELS),
    }


def _full_spec(arr):
    zeros = (0,) * arr.ndim
    return pl.BlockSpec(arr.shape, lambda b, _z=zeros: _z)


# ---------------- forward pass (== BertModule.forward -> logits) ----------------
@jax.jit
def bert_forward(p, input_ids, attention_mask, token_type_ids):
    B, S = input_ids.shape
    H = HIDDEN

    # embeddings (gathers stay in plain JAX)
    pos_ids = jnp.arange(S)
    emb = (p["word_emb"][input_ids]
           + p["pos_emb"][pos_ids][None, :, :]
           + p["type_emb"][token_type_ids])                           # [B, S, H]

    # HF extended attention mask: (1 - mask) * -10000
    mask_bias = ((1.0 - attention_mask.astype(jnp.float32)) * -10000.0).reshape(B, 1, S)

    operands = (emb, mask_bias,
                p["eln"], p["wqkv"], p["bqkv"], p["wo"], p["vecs"],
                p["wi"], p["bi"], p["wo2"],
                p["pw"], p["pb"], p["cw"], p["cb"])

    in_specs = [pl.BlockSpec((1, S, H), lambda b: (b, 0, 0)),       # per-example activations
                pl.BlockSpec((1, 1, S), lambda b: (b, 0, 0))]       # per-example mask bias
    in_specs += [_full_spec(a) for a in operands[2:]]               # weights: resident, shared

    logits = pl.pallas_call(
        functools.partial(_bert_kernel, scale=1.0 / (HEAD_DIM ** 0.5), eps=LN_EPS),
        grid=(B,),
        in_specs=in_specs,
        out_specs=pl.BlockSpec((1, 1, NUM_LABELS), lambda b: (b, 0, 0)),
        out_shape=jax.ShapeDtypeStruct((B, 1, NUM_LABELS), jnp.float32),
        compiler_params=pltpu.CompilerParams(dimension_semantics=("parallel",)),
    )(*operands)
    return logits.reshape(B, NUM_LABELS)


if __name__ == "__main__":
    root = jax.random.PRNGKey(0)
    k_param, k_ids = jax.random.split(root)

    params = init_params(k_param)
    packed = pack_params(params)

    input_ids = jax.random.randint(k_ids, (BATCH, SEQ), 0, VOCAB, dtype=jnp.int32)
    attention_mask = jnp.ones((BATCH, SEQ), dtype=jnp.int32)
    token_type_ids = jnp.zeros((BATCH, SEQ), dtype=jnp.int32)

    logits = bert_forward(packed, input_ids, attention_mask, token_type_ids)
    logits = jax.block_until_ready(logits)
    assert logits.shape == (BATCH, NUM_LABELS)
    assert bool(jnp.all(jnp.isfinite(logits)))
    print("KERNEL_OK")
</pallas_src>

<mosaic_0001>
module attributes {stable_mosaic.version = 11 : i64} {
  func.func @_bert_kernel(%arg0: i32, %arg1: memref<1x8x32xf32, #tpu.memory_space<vmem>>, %arg2: memref<1x1x8xf32, #tpu.memory_space<vmem>>, %arg3: memref<2x1x32xf32, #tpu.memory_space<vmem>>, %arg4: memref<2x3x2x32x16xf32, #tpu.memory_space<vmem>>, %arg5: memref<2x3x2x1x16xf32, #tpu.memory_space<vmem>>, %arg6: memref<2x2x16x32xf32, #tpu.memory_space<vmem>>, %arg7: memref<2x6x1x32xf32, #tpu.memory_space<vmem>>, %arg8: memref<2x32x64xf32, #tpu.memory_space<vmem>>, %arg9: memref<2x1x64xf32, #tpu.memory_space<vmem>>, %arg10: memref<2x64x32xf32, #tpu.memory_space<vmem>>, %arg11: memref<32x32xf32, #tpu.memory_space<vmem>>, %arg12: memref<1x32xf32, #tpu.memory_space<vmem>>, %arg13: memref<32x3xf32, #tpu.memory_space<vmem>>, %arg14: memref<1x3xf32, #tpu.memory_space<vmem>>, %arg15: memref<1x1x3xf32, #tpu.memory_space<vmem>>) attributes {dimension_semantics = [#tpu.dimension_semantics<parallel>], iteration_bounds = array<i64: 2>, scalar_prefetch = 0 : i64, scratch_operands = 0 : i64, tpu.core_type = #tpu.core_type<tc>, window_params = [{transform_indices = @transform_0, window_bounds = array<i64: 1, 8, 32>}, {transform_indices = @transform_1, window_bounds = array<i64: 1, 1, 8>}, {pipeline_mode = #tpu.pipeline_mode<synchronous>, transform_indices = @transform_2, window_bounds = array<i64: 2, 1, 32>}, {pipeline_mode = #tpu.pipeline_mode<synchronous>, transform_indices = @transform_3, window_bounds = array<i64: 2, 3, 2, 32, 16>}, {pipeline_mode = #tpu.pipeline_mode<synchronous>, transform_indices = @transform_4, window_bounds = array<i64: 2, 3, 2, 1, 16>}, {pipeline_mode = #tpu.pipeline_mode<synchronous>, transform_indices = @transform_5, window_bounds = array<i64: 2, 2, 16, 32>}, {pipeline_mode = #tpu.pipeline_mode<synchronous>, transform_indices = @transform_6, window_bounds = array<i64: 2, 6, 1, 32>}, {pipeline_mode = #tpu.pipeline_mode<synchronous>, transform_indices = @transform_7, window_bounds = array<i64: 2, 32, 64>}, {pipeline_mode = #tpu.pipeline_mode<synchronous>, transform_indices = @transform_8, window_bounds = array<i64: 2, 1, 64>}, {pipeline_mode = #tpu.pipeline_mode<synchronous>, transform_indices = @transform_9, window_bounds = array<i64: 2, 64, 32>}, {pipeline_mode = #tpu.pipeline_mode<synchronous>, transform_indices = @transform_10, window_bounds = array<i64: 32, 32>}, {pipeline_mode = #tpu.pipeline_mode<synchronous>, transform_indices = @transform_11, window_bounds = array<i64: 1, 32>}, {pipeline_mode = #tpu.pipeline_mode<synchronous>, transform_indices = @transform_12, window_bounds = array<i64: 32, 3>}, {pipeline_mode = #tpu.pipeline_mode<synchronous>, transform_indices = @transform_13, window_bounds = array<i64: 1, 3>}, {transform_indices = @transform_14, window_bounds = array<i64: 1, 1, 3>}]} {
    %c0 = arith.constant 0 : index
    %c0_0 = arith.constant 0 : index
    %c0_1 = arith.constant 0 : index
    %0 = vector.load %arg1[%c0, %c0_0, %c0_1] : memref<1x8x32xf32, #tpu.memory_space<vmem>>, vector<1x8x32xf32>
    %1 = vector.shape_cast %0 : vector<1x8x32xf32> to vector<8x32xf32>
    %c0_2 = arith.constant 0 : index
    %c0_3 = arith.constant 0 : index
    %c0_4 = arith.constant 0 : index
    %2 = vector.load %arg2[%c0_2, %c0_3, %c0_4] : memref<1x1x8xf32, #tpu.memory_space<vmem>>, vector<1x1x8xf32>
    %3 = vector.shape_cast %2 : vector<1x1x8xf32> to vector<1x8xf32>
    %c0_5 = arith.constant 0 : index
    %c0_6 = arith.constant 0 : index
    %c0_7 = arith.constant 0 : index
    %4 = vector.load %arg3[%c0_5, %c0_6, %c0_7] : memref<2x1x32xf32, #tpu.memory_space<vmem>>, vector<1x1x32xf32>
    %5 = vector.shape_cast %4 : vector<1x1x32xf32> to vector<1x32xf32>
    %c1 = arith.constant 1 : index
    %c0_8 = arith.constant 0 : index
    %c0_9 = arith.constant 0 : index
    %6 = vector.load %arg3[%c1, %c0_8, %c0_9] : memref<2x1x32xf32, #tpu.memory_space<vmem>>, vector<1x1x32xf32>
    %7 = vector.shape_cast %6 : vector<1x1x32xf32> to vector<1x32xf32>
    %cst = arith.constant dense<0.000000e+00> : vector<8xf32>
    %8 = vector.multi_reduction <add>, %1, %cst [1] : vector<8x32xf32> to vector<8xf32>
    %9 = vector.shape_cast %8 : vector<8xf32> to vector<8x1xf32>
    %cst_10 = arith.constant 3.200000e+01 : f32
    %10 = vector.broadcast %cst_10 : f32 to vector<8x1xf32>
    %11 = arith.divf %9, %10 : vector<8x1xf32>
    %12 = vector.broadcast %11 : vector<8x1xf32> to vector<8x32xf32>
    %13 = arith.subf %1, %12 : vector<8x32xf32>
    %14 = vector.broadcast %11 : vector<8x1xf32> to vector<8x32xf32>
    %15 = arith.subf %1, %14 : vector<8x32xf32>
    %16 = arith.mulf %13, %15 : vector<8x32xf32>
    %cst_11 = arith.constant dense<0.000000e+00> : vector<8xf32>
    %17 = vector.multi_reduction <add>, %16, %cst_11 [1] : vector<8x32xf32> to vector<8xf32>
    %18 = vector.shape_cast %17 : vector<8xf32> to vector<8x1xf32>
    %cst_12 = arith.constant 3.200000e+01 : f32
    %19 = vector.broadcast %cst_12 : f32 to vector<8x1xf32>
    %20 = arith.divf %18, %19 : vector<8x1xf32>
    %21 = vector.broadcast %11 : vector<8x1xf32> to vector<8x32xf32>
    %22 = arith.subf %1, %21 : vector<8x32xf32>
    %cst_13 = arith.constant 9.99999996E-13 : f32
    %23 = vector.broadcast %cst_13 : f32 to vector<8x1xf32>
    %24 = arith.addf %20, %23 : vector<8x1xf32>
    %25 = math.rsqrt %24 : vector<8x1xf32>
    %26 = vector.broadcast %25 : vector<8x1xf32> to vector<8x32xf32>
    %27 = arith.mulf %22, %26 : vector<8x32xf32>
    %28 = vector.broadcast %5 : vector<1x32xf32> to vector<8x32xf32>
    %29 = arith.mulf %27, %28 : vector<8x32xf32>
    %30 = vector.broadcast %7 : vector<1x32xf32> to vector<8x32xf32>
    %31 = arith.addf %29, %30 : vector<8x32xf32>
    %cst_14 = arith.constant 0.000000e+00 : f32
    %32 = vector.broadcast %cst_14 : f32 to vector<8x32xf32>
    %c0_15 = arith.constant 0 : index
    %c0_16 = arith.constant 0 : index
    %c0_17 = arith.constant 0 : index
    %c0_18 = arith.constant 0 : index
    %c0_19 = arith.constant 0 : index
    %33 = vector.load %arg4[%c0_15, %c0_16, %c0_17, %c0_18, %c0_19] : memref<2x3x2x32x16xf32, #tpu.memory_space<vmem>>, vector<1x1x1x32x16xf32>
    %34 = vector.shape_cast %33 : vector<1x1x1x32x16xf32> to vector<32x16xf32>
    %cst_20 = arith.constant dense<0.000000e+00> : vector<8x16xf32>
    %35 = tpu.matmul %31, %34, %cst_20 {dimension_numbers = #tpu.dot_dimension_numbers<[1], [0], [0], [1], [0, 0, 1, 1], [], []>} : vector<8x32xf32>, vector<32x16xf32>, vector<8x16xf32> -> vector<8x16xf32>
    %c0_21 = arith.constant 0 : index
    %c0_22 = arith.constant 0 : index
    %c0_23 = arith.constant 0 : index
    %c0_24 = arith.constant 0 : index
    %c0_25 = arith.constant 0 : index
    %36 = vector.load %arg5[%c0_21, %c0_22, %c0_23, %c0_24, %c0_25] : memref<2x3x2x1x16xf32, #tpu.memory_space<vmem>>, vector<1x1x1x1x16xf32>
    %37 = vector.shape_cast %36 : vector<1x1x1x1x16xf32> to vector<1x16xf32>
    %38 = vector.broadcast %37 : vector<1x16xf32> to vector<8x16xf32>
    %39 = arith.addf %35, %38 : vector<8x16xf32>
    %c0_26 = arith.constant 0 : index
    %c1_27 = arith.constant 1 : index
    %c0_28 = arith.constant 0 : index
    %c0_29 = arith.constant 0 : index
    %c0_30 = arith.constant 0 : index
    %40 = vector.load %arg4[%c0_26, %c1_27, %c0_28, %c0_29, %c0_30] : memref<2x3x2x32x16xf32, #tpu.memory_space<vmem>>, vector<1x1x1x32x16xf32>
    %41 = vector.shape_cast %40 : vector<1x1x1x32x16xf32> to vector<32x16xf32>
    %cst_31 = arith.constant dense<0.000000e+00> : vector<8x16xf32>
    %42 = tpu.matmul %31, %41, %cst_31 {dimension_numbers = #tpu.dot_dimension_numbers<[1], [0], [0], [1], [0, 0, 1, 1], [], []>} : vector<8x32xf32>, vector<32x16xf32>, vector<8x16xf32> -> vector<8x16xf32>
    %c0_32 = arith.constant 0 : index
    %c1_33 = arith.constant 1 : index
    %c0_34 = arith.constant 0 : index
    %c0_35 = arith.constant 0 : index
    %c0_36 = arith.constant 0 : index
    %43 = vector.load %arg5[%c0_32, %c1_33, %c0_34, %c0_35, %c0_36] : memref<2x3x2x1x16xf32, #tpu.memory_space<vmem>>, vector<1x1x1x1x16xf32>
    %44 = vector.shape_cast %43 : vector<1x1x1x1x16xf32> to vector<1x16xf32>
    %45 = vector.broadcast %44 : vector<1x16xf32> to vector<8x16xf32>
    %46 = arith.addf %42, %45 : vector<8x16xf32>
    %c0_37 = arith.constant 0 : index
    %c2 = arith.constant 2 : index
    %c0_38 = arith.constant 0 : index
    %c0_39 = arith.constant 0 : index
    %c0_40 = arith.constant 0 : index
    %47 = vector.load %arg4[%c0_37, %c2, %c0_38, %c0_39, %c0_40] : memref<2x3x2x32x16xf32, #tpu.memory_space<vmem>>, vector<1x1x1x32x16xf32>
    %48 = vector.shape_cast %47 : vector<1x1x1x32x16xf32> to vector<32x16xf32>
    %cst_41 = arith.constant dense<0.000000e+00> : vector<8x16xf32>
    %49 = tpu.matmul %31, %48, %cst_41 {dimension_numbers = #tpu.dot_dimension_numbers<[1], [0], [0], [1], [0, 0, 1, 1], [], []>} : vector<8x32xf32>, vector<32x16xf32>, vector<8x16xf32> -> vector<8x16xf32>
    %c0_42 = arith.constant 0 : index
    %c2_43 = arith.constant 2 : index
    %c0_44 = arith.constant 0 : index
    %c0_45 = arith.constant 0 : index
    %c0_46 = arith.constant 0 : index
    %50 = vector.load %arg5[%c0_42, %c2_43, %c0_44, %c0_45, %c0_46] : memref<2x3x2x1x16xf32, #tpu.memory_space<vmem>>, vector<1x1x1x1x16xf32>
    %51 = vector.shape_cast %50 : vector<1x1x1x1x16xf32> to vector<1x16xf32>
    %52 = vector.broadcast %51 : vector<1x16xf32> to vector<8x16xf32>
    %53 = arith.addf %49, %52 : vector<8x16xf32>
    %54 = tpu.transpose %46, [1, 0] : vector<8x16xf32> -> vector<16x8xf32>
    %cst_47 = arith.constant dense<0.000000e+00> : vector<8x8xf32>
    %55 = tpu.matmul %39, %54, %cst_47 {dimension_numbers = #tpu.dot_dimension_numbers<[1], [0], [0], [1], [0, 0, 1, 1], [], []>} : vector<8x16xf32>, vector<16x8xf32>, vector<8x8xf32> -> vector<8x8xf32>
    %cst_48 = arith.constant 2.500000e-01 : f32
    %56 = vector.broadcast %cst_48 : f32 to vector<8x8xf32>
    %57 = arith.mulf %55, %56 : vector<8x8xf32>
    %58 = vector.broadcast %3 : vector<1x8xf32> to vector<8x8xf32>
    %59 = arith.addf %57, %58 : vector<8x8xf32>
    %cst_49 = arith.constant dense<0xFF800000> : vector<8xf32>
    %60 = vector.multi_reduction <maximumf>, %59, %cst_49 [1] : vector<8x8xf32> to vector<8xf32>
    %61 = vector.shape_cast %60 : vector<8xf32> to vector<8x1xf32>
    %62 = vector.broadcast %61 : vector<8x1xf32> to vector<8x8xf32>
    %63 = arith.subf %59, %62 : vector<8x8xf32>
    %64 = math.exp %63 : vector<8x8xf32>
    %cst_50 = arith.constant dense<0.000000e+00> : vector<8xf32>
    %65 = vector.multi_reduction <add>, %64, %cst_50 [1] : vector<8x8xf32> to vector<8xf32>
    %66 = vector.shape_cast %65 : vector<8xf32> to vector<8x1xf32>
    %67 = tpu.reciprocal %66 {approx = true} : vector<8x1xf32> -> vector<8x1xf32>
    %68 = vector.broadcast %67 : vector<8x1xf32> to vector<8x8xf32>
    %69 = arith.mulf %64, %68 : vector<8x8xf32>
    %cst_51 = arith.constant dense<0.000000e+00> : vector<8x16xf32>
    %70 = tpu.matmul %69, %53, %cst_51 {dimension_numbers = #tpu.dot_dimension_numbers<[1], [0], [0], [1], [0, 0, 1, 1], [], []>} : vector<8x8xf32>, vector<8x16xf32>, vector<8x16xf32> -> vector<8x16xf32>
    %c0_52 = arith.constant 0 : index
    %c0_53 = arith.constant 0 : index
    %c0_54 = arith.constant 0 : index
    %c0_55 = arith.constant 0 : index
    %71 = vector.load %arg6[%c0_52, %c0_53, %c0_54, %c0_55] : memref<2x2x16x32xf32, #tpu.memory_space<vmem>>, vector<1x1x16x32xf32>
    %72 = vector.shape_cast %71 : vector<1x1x16x32xf32> to vector<16x32xf32>
    %cst_56 = arith.constant dense<0.000000e+00> : vector<8x32xf32>
    %73 = tpu.matmul %70, %72, %cst_56 {dimension_numbers = #tpu.dot_dimension_numbers<[1], [0], [0], [1], [0, 0, 1, 1], [], []>} : vector<8x16xf32>, vector<16x32xf32>, vector<8x32xf32> -> vector<8x32xf32>
    %74 = arith.addf %32, %73 : vector<8x32xf32>
    %c0_57 = arith.constant 0 : index
    %c0_58 = arith.constant 0 : index
    %c1_59 = arith.constant 1 : index
    %c0_60 = arith.constant 0 : index
    %c0_61 = arith.constant 0 : index
    %75 = vector.load %arg4[%c0_57, %c0_58, %c1_59, %c0_60, %c0_61] : memref<2x3x2x32x16xf32, #tpu.memory_space<vmem>>, vector<1x1x1x32x16xf32>
    %76 = vector.shape_cast %75 : vector<1x1x1x32x16xf32> to vector<32x16xf32>
    %cst_62 = arith.constant dense<0.000000e+00> : vector<8x16xf32>
    %77 = tpu.matmul %31, %76, %cst_62 {dimension_numbers = #tpu.dot_dimension_numbers<[1], [0], [0], [1], [0, 0, 1, 1], [], []>} : vector<8x32xf32>, vector<32x16xf32>, vector<8x16xf32> -> vector<8x16xf32>
    %c0_63 = arith.constant 0 : index
    %c0_64 = arith.constant 0 : index
    %c1_65 = arith.constant 1 : index
    %c0_66 = arith.constant 0 : index
    %c0_67 = arith.constant 0 : index
    %78 = vector.load %arg5[%c0_63, %c0_64, %c1_65, %c0_66, %c0_67] : memref<2x3x2x1x16xf32, #tpu.memory_space<vmem>>, vector<1x1x1x1x16xf32>
    %79 = vector.shape_cast %78 : vector<1x1x1x1x16xf32> to vector<1x16xf32>
    %80 = vector.broadcast %79 : vector<1x16xf32> to vector<8x16xf32>
    %81 = arith.addf %77, %80 : vector<8x16xf32>
    %c0_68 = arith.constant 0 : index
    %c1_69 = arith.constant 1 : index
    %c1_70 = arith.constant 1 : index
    %c0_71 = arith.constant 0 : index
    %c0_72 = arith.constant 0 : index
    %82 = vector.load %arg4[%c0_68, %c1_69, %c1_70, %c0_71, %c0_72] : memref<2x3x2x32x16xf32, #tpu.memory_space<vmem>>, vector<1x1x1x32x16xf32>
    %83 = vector.shape_cast %82 : vector<1x1x1x32x16xf32> to vector<32x16xf32>
    %cst_73 = arith.constant dense<0.000000e+00> : vector<8x16xf32>
    %84 = tpu.matmul %31, %83, %cst_73 {dimension_numbers = #tpu.dot_dimension_numbers<[1], [0], [0], [1], [0, 0, 1, 1], [], []>} : vector<8x32xf32>, vector<32x16xf32>, vector<8x16xf32> -> vector<8x16xf32>
    %c0_74 = arith.constant 0 : index
    %c1_75 = arith.constant 1 : index
    %c1_76 = arith.constant 1 : index
    %c0_77 = arith.constant 0 : index
    %c0_78 = arith.constant 0 : index
    %85 = vector.load %arg5[%c0_74, %c1_75, %c1_76, %c0_77, %c0_78] : memref<2x3x2x1x16xf32, #tpu.memory_space<vmem>>, vector<1x1x1x1x16xf32>
    %86 = vector.shape_cast %85 : vector<1x1x1x1x16xf32> to vector<1x16xf32>
    %87 = vector.broadcast %86 : vector<1x16xf32> to vector<8x16xf32>
    %88 = arith.addf %84, %87 : vector<8x16xf32>
    %c0_79 = arith.constant 0 : index
    %c2_80 = arith.constant 2 : index
    %c1_81 = arith.constant 1 : index
    %c0_82 = arith.constant 0 : index
    %c0_83 = arith.constant 0 : index
    %89 = vector.load %arg4[%c0_79, %c2_80, %c1_81, %c0_82, %c0_83] : memref<2x3x2x32x16xf32, #tpu.memory_space<vmem>>, vector<1x1x1x32x16xf32>
    %90 = vector.shape_cast %89 : vector<1x1x1x32x16xf32> to vector<32x16xf32>
    %cst_84 = arith.constant dense<0.000000e+00> : vector<8x16xf32>
    %91 = tpu.matmul %31, %90, %cst_84 {dimension_numbers = #tpu.dot_dimension_numbers<[1], [0], [0], [1], [0, 0, 1, 1], [], []>} : vector<8x32xf32>, vector<32x16xf32>, vector<8x16xf32> -> vector<8x16xf32>
    %c0_85 = arith.constant 0 : index
    %c2_86 = arith.constant 2 : index
    %c1_87 = arith.constant 1 : index
    %c0_88 = arith.constant 0 : index
    %c0_89 = arith.constant 0 : index
    %92 = vector.load %arg5[%c0_85, %c2_86, %c1_87, %c0_88, %c0_89] : memref<2x3x2x1x16xf32, #tpu.memory_space<vmem>>, vector<1x1x1x1x16xf32>
    %93 = vector.shape_cast %92 : vector<1x1x1x1x16xf32> to vector<1x16xf32>
    %94 = vector.broadcast %93 : vector<1x16xf32> to vector<8x16xf32>
    %95 = arith.addf %91, %94 : vector<8x16xf32>
    %96 = tpu.transpose %88, [1, 0] : vector<8x16xf32> -> vector<16x8xf32>
    %cst_90 = arith.constant dense<0.000000e+00> : vector<8x8xf32>
    %97 = tpu.matmul %81, %96, %cst_90 {dimension_numbers = #tpu.dot_dimension_numbers<[1], [0], [0], [1], [0, 0, 1, 1], [], []>} : vector<8x16xf32>, vector<16x8xf32>, vector<8x8xf32> -> vector<8x8xf32>
    %cst_91 = arith.constant 2.500000e-01 : f32
    %98 = vector.broadcast %cst_91 : f32 to vector<8x8xf32>
    %99 = arith.mulf %97, %98 : vector<8x8xf32>
    %100 = vector.broadcast %3 : vector<1x8xf32> to vector<8x8xf32>
    %101 = arith.addf %99, %100 : vector<8x8xf32>
    %cst_92 = arith.constant dense<0xFF800000> : vector<8xf32>
    %102 = vector.multi_reduction <maximumf>, %101, %cst_92 [1] : vector<8x8xf32> to vector<8xf32>
    %103 = vector.shape_cast %102 : vector<8xf32> to vector<8x1xf32>
    %104 = vector.broadcast %103 : vector<8x1xf32> to vector<8x8xf32>
    %105 = arith.subf %101, %104 : vector<8x8xf32>
    %106 = math.exp %105 : vector<8x8xf32>
    %cst_93 = arith.constant dense<0.000000e+00> : vector<8xf32>
    %107 = vector.multi_reduction <add>, %106, %cst_93 [1] : vector<8x8xf32> to vector<8xf32>
    %108 = vector.shape_cast %107 : vector<8xf32> to vector<8x1xf32>
    %109 = tpu.reciprocal %108 {approx = true} : vector<8x1xf32> -> vector<8x1xf32>
    %110 = vector.broadcast %109 : vector<8x1xf32> to vector<8x8xf32>
    %111 = arith.mulf %106, %110 : vector<8x8xf32>
    %cst_94 = arith.constant dense<0.000000e+00> : vector<8x16xf32>
    %112 = tpu.matmul %111, %95, %cst_94 {dimension_numbers = #tpu.dot_dimension_numbers<[1], [0], [0], [1], [0, 0, 1, 1], [], []>} : vector<8x8xf32>, vector<8x16xf32>, vector<8x16xf32> -> vector<8x16xf32>
    %c0_95 = arith.constant 0 : index
    %c1_96 = arith.constant 1 : index
    %c0_97 = arith.constant 0 : index
    %c0_98 = arith.constant 0 : index
    %113 = vector.load %arg6[%c0_95, %c1_96, %c0_97, %c0_98] : memref<2x2x16x32xf32, #tpu.memory_space<vmem>>, vector<1x1x16x32xf32>
    %114 = vector.shape_cast %113 : vector<1x1x16x32xf32> to vector<16x32xf32>
    %cst_99 = arith.constant dense<0.000000e+00> : vector<8x32xf32>
    %115 = tpu.matmul %112, %114, %cst_99 {dimension_numbers = #tpu.dot_dimension_numbers<[1], [0], [0], [1], [0, 0, 1, 1], [], []>} : vector<8x16xf32>, vector<16x32xf32>, vector<8x32xf32> -> vector<8x32xf32>
    %116 = arith.addf %74, %115 : vector<8x32xf32>
    %c0_100 = arith.constant 0 : index
    %c0_101 = arith.constant 0 : index
    %c0_102 = arith.constant 0 : index
    %c0_103 = arith.constant 0 : index
    %117 = vector.load %arg7[%c0_100, %c0_101, %c0_102, %c0_103] : memref<2x6x1x32xf32, #tpu.memory_space<vmem>>, vector<1x1x1x32xf32>
    %118 = vector.shape_cast %117 : vector<1x1x1x32xf32> to vector<1x32xf32>
    %119 = vector.broadcast %118 : vector<1x32xf32> to vector<8x32xf32>
    %120 = arith.addf %116, %119 : vector<8x32xf32>
    %121 = arith.addf %120, %31 : vector<8x32xf32>
    %c0_104 = arith.constant 0 : index
    %c1_105 = arith.constant 1 : index
    %c0_106 = arith.constant 0 : index
    %c0_107 = arith.constant 0 : index
    %122 = vector.load %arg7[%c0_104, %c1_105, %c0_106, %c0_107] : memref<2x6x1x32xf32, #tpu.memory_space<vmem>>, vector<1x1x1x32xf32>
    %123 = vector.shape_cast %122 : vector<1x1x1x32xf32> to vector<1x32xf32>
    %c0_108 = arith.constant 0 : index
    %c2_109 = arith.constant 2 : index
    %c0_110 = arith.constant 0 : index
    %c0_111 = arith.constant 0 : index
    %124 = vector.load %arg7[%c0_108, %c2_109, %c0_110, %c0_111] : memref<2x6x1x32xf32, #tpu.memory_space<vmem>>, vector<1x1x1x32xf32>
    %125 = vector.shape_cast %124 : vector<1x1x1x32xf32> to vector<1x32xf32>
    %cst_112 = arith.constant dense<0.000000e+00> : vector<8xf32>
    %126 = vector.multi_reduction <add>, %121, %cst_112 [1] : vector<8x32xf32> to vector<8xf32>
    %127 = vector.shape_cast %126 : vector<8xf32> to vector<8x1xf32>
    %cst_113 = arith.constant 3.200000e+01 : f32
    %128 = vector.broadcast %cst_113 : f32 to vector<8x1xf32>
    %129 = arith.divf %127, %128 : vector<8x1xf32>
    %130 = vector.broadcast %129 : vector<8x1xf32> to vector<8x32xf32>
    %131 = arith.subf %121, %130 : vector<8x32xf32>
    %132 = vector.broadcast %129 : vector<8x1xf32> to vector<8x32xf32>
    %133 = arith.subf %121, %132 : vector<8x32xf32>
    %134 = arith.mulf %131, %133 : vector<8x32xf32>
    %cst_114 = arith.constant dense<0.000000e+00> : vector<8xf32>
    %135 = vector.multi_reduction <add>, %134, %cst_114 [1] : vector<8x32xf32> to vector<8xf32>
    %136 = vector.shape_cast %135 : vector<8xf32> to vector<8x1xf32>
    %cst_115 = arith.constant 3.200000e+01 : f32
    %137 = vector.broadcast %cst_115 : f32 to vector<8x1xf32>
    %138 = arith.divf %136, %137 : vector<8x1xf32>
    %139 = vector.broadcast %129 : vector<8x1xf32> to vector<8x32xf32>
    %140 = arith.subf %121, %139 : vector<8x32xf32>
    %cst_116 = arith.constant 9.99999996E-13 : f32
    %141 = vector.broadcast %cst_116 : f32 to vector<8x1xf32>
    %142 = arith.addf %138, %141 : vector<8x1xf32>
    %143 = math.rsqrt %142 : vector<8x1xf32>
    %144 = vector.broadcast %143 : vector<8x1xf32> to vector<8x32xf32>
    %145 = arith.mulf %140, %144 : vector<8x32xf32>
    %146 = vector.broadcast %123 : vector<1x32xf32> to vector<8x32xf32>
    %147 = arith.mulf %145, %146 : vector<8x32xf32>
    %148 = vector.broadcast %125 : vector<1x32xf32> to vector<8x32xf32>
    %149 = arith.addf %147, %148 : vector<8x32xf32>
    %c0_117 = arith.constant 0 : index
    %c0_118 = arith.constant 0 : index
    %c0_119 = arith.constant 0 : index
    %150 = vector.load %arg8[%c0_117, %c0_118, %c0_119] : memref<2x32x64xf32, #tpu.memory_space<vmem>>, vector<1x32x64xf32>
    %151 = vector.shape_cast %150 : vector<1x32x64xf32> to vector<32x64xf32>
    %cst_120 = arith.constant dense<0.000000e+00> : vector<8x64xf32>
    %152 = tpu.matmul %149, %151, %cst_120 {dimension_numbers = #tpu.dot_dimension_numbers<[1], [0], [0], [1], [0, 0, 1, 1], [], []>} : vector<8x32xf32>, vector<32x64xf32>, vector<8x64xf32> -> vector<8x64xf32>
    %c0_121 = arith.constant 0 : index
    %c0_122 = arith.constant 0 : index
    %c0_123 = arith.constant 0 : index
    %153 = vector.load %arg9[%c0_121, %c0_122, %c0_123] : memref<2x1x64xf32, #tpu.memory_space<vmem>>, vector<1x1x64xf32>
    %154 = vector.shape_cast %153 : vector<1x1x64xf32> to vector<1x64xf32>
    %155 = vector.broadcast %154 : vector<1x64xf32> to vector<8x64xf32>
    %156 = arith.addf %152, %155 : vector<8x64xf32>
    %cst_124 = arith.constant 5.000000e-01 : f32
    %157 = vector.broadcast %cst_124 : f32 to vector<8x64xf32>
    %158 = arith.mulf %157, %156 : vector<8x64xf32>
    %cst_125 = arith.constant 4.471500e-02 : f32
    %159 = vector.broadcast %cst_125 : f32 to vector<8x64xf32>
    %160 = arith.mulf %159, %156 : vector<8x64xf32>
    %161 = arith.mulf %160, %156 : vector<8x64xf32>
    %162 = arith.mulf %161, %156 : vector<8x64xf32>
    %163 = arith.addf %156, %162 : vector<8x64xf32>
    %cst_126 = arith.constant 0.797884583 : f32
    %164 = vector.broadcast %cst_126 : f32 to vector<8x64xf32>
    %165 = arith.mulf %164, %163 : vector<8x64xf32>
    %166 = math.tanh %165 : vector<8x64xf32>
    %cst_127 = arith.constant 1.000000e+00 : f32
    %167 = vector.broadcast %cst_127 : f32 to vector<8x64xf32>
    %168 = arith.addf %167, %166 : vector<8x64xf32>
    %169 = arith.mulf %158, %168 : vector<8x64xf32>
    %c0_128 = arith.constant 0 : index
    %c0_129 = arith.constant 0 : index
    %c0_130 = arith.constant 0 : index
    %170 = vector.load %arg10[%c0_128, %c0_129, %c0_130] : memref<2x64x32xf32, #tpu.memory_space<vmem>>, vector<1x64x32xf32>
    %171 = vector.shape_cast %170 : vector<1x64x32xf32> to vector<64x32xf32>
    %cst_131 = arith.constant dense<0.000000e+00> : vector<8x32xf32>
    %172 = tpu.matmul %169, %171, %cst_131 {dimension_numbers = #tpu.dot_dimension_numbers<[1], [0], [0], [1], [0, 0, 1, 1], [], []>} : vector<8x64xf32>, vector<64x32xf32>, vector<8x32xf32> -> vector<8x32xf32>
    %c0_132 = arith.constant 0 : index
    %c3 = arith.constant 3 : index
    %c0_133 = arith.constant 0 : index
    %c0_134 = arith.constant 0 : index
    %173 = vector.load %arg7[%c0_132, %c3, %c0_133, %c0_134] : memref<2x6x1x32xf32, #tpu.memory_space<vmem>>, vector<1x1x1x32xf32>
    %174 = vector.shape_cast %173 : vector<1x1x1x32xf32> to vector<1x32xf32>
    %175 = vector.broadcast %174 : vector<1x32xf32> to vector<8x32xf32>
    %176 = arith.addf %172, %175 : vector<8x32xf32>
    %177 = arith.addf %176, %149 : vector<8x32xf32>
    %c0_135 = arith.constant 0 : index
    %c4 = arith.constant 4 : index
    %c0_136 = arith.constant 0 : index
    %c0_137 = arith.constant 0 : index
    %178 = vector.load %arg7[%c0_135, %c4, %c0_136, %c0_137] : memref<2x6x1x32xf32, #tpu.memory_space<vmem>>, vector<1x1x1x32xf32>
    %179 = vector.shape_cast %178 : vector<1x1x1x32xf32> to vector<1x32xf32>
    %c0_138 = arith.constant 0 : index
    %c5 = arith.constant 5 : index
    %c0_139 = arith.constant 0 : index
    %c0_140 = arith.constant 0 : index
    %180 = vector.load %arg7[%c0_138, %c5, %c0_139, %c0_140] : memref<2x6x1x32xf32, #tpu.memory_space<vmem>>, vector<1x1x1x32xf32>
    %181 = vector.shape_cast %180 : vector<1x1x1x32xf32> to vector<1x32xf32>
    %cst_141 = arith.constant dense<0.000000e+00> : vector<8xf32>
    %182 = vector.multi_reduction <add>, %177, %cst_141 [1] : vector<8x32xf32> to vector<8xf32>
    %183 = vector.shape_cast %182 : vector<8xf32> to vector<8x1xf32>
    %cst_142 = arith.constant 3.200000e+01 : f32
    %184 = vector.broadcast %cst_142 : f32 to vector<8x1xf32>
    %185 = arith.divf %183, %184 : vector<8x1xf32>
    %186 = vector.broadcast %185 : vector<8x1xf32> to vector<8x32xf32>
    %187 = arith.subf %177, %186 : vector<8x32xf32>
    %188 = vector.broadcast %185 : vector<8x1xf32> to vector<8x32xf32>
    %189 = arith.subf %177, %188 : vector<8x32xf32>
    %190 = arith.mulf %187, %189 : vector<8x32xf32>
    %cst_143 = arith.constant dense<0.000000e+00> : vector<8xf32>
    %191 = vector.multi_reduction <add>, %190, %cst_143 [1] : vector<8x32xf32> to vector<8xf32>
    %192 = vector.shape_cast %191 : vector<8xf32> to vector<8x1xf32>
    %cst_144 = arith.constant 3.200000e+01 : f32
    %193 = vector.broadcast %cst_144 : f32 to vector<8x1xf32>
    %194 = arith.divf %192, %193 : vector<8x1xf32>
    %195 = vector.broadcast %185 : vector<8x1xf32> to vector<8x32xf32>
    %196 = arith.subf %177, %195 : vector<8x32xf32>
    %cst_145 = arith.constant 9.99999996E-13 : f32
    %197 = vector.broadcast %cst_145 : f32 to vector<8x1xf32>
    %198 = arith.addf %194, %197 : vector<8x1xf32>
    %199 = math.rsqrt %198 : vector<8x1xf32>
    %200 = vector.broadcast %199 : vector<8x1xf32> to vector<8x32xf32>
    %201 = arith.mulf %196, %200 : vector<8x32xf32>
    %202 = vector.broadcast %179 : vector<1x32xf32> to vector<8x32xf32>
    %203 = arith.mulf %201, %202 : vector<8x32xf32>
    %204 = vector.broadcast %181 : vector<1x32xf32> to vector<8x32xf32>
    %205 = arith.addf %203, %204 : vector<8x32xf32>
    %cst_146 = arith.constant 0.000000e+00 : f32
    %206 = vector.broadcast %cst_146 : f32 to vector<8x32xf32>
    %c1_147 = arith.constant 1 : index
    %c0_148 = arith.constant 0 : index
    %c0_149 = arith.constant 0 : index
    %c0_150 = arith.constant 0 : index
    %c0_151 = arith.constant 0 : index
    %207 = vector.load %arg4[%c1_147, %c0_148, %c0_149, %c0_150, %c0_151] : memref<2x3x2x32x16xf32, #tpu.memory_space<vmem>>, vector<1x1x1x32x16xf32>
    %208 = vector.shape_cast %207 : vector<1x1x1x32x16xf32> to vector<32x16xf32>
    %cst_152 = arith.constant dense<0.000000e+00> : vector<8x16xf32>
    %209 = tpu.matmul %205, %208, %cst_152 {dimension_numbers = #tpu.dot_dimension_numbers<[1], [0], [0], [1], [0, 0, 1, 1], [], []>} : vector<8x32xf32>, vector<32x16xf32>, vector<8x16xf32> -> vector<8x16xf32>
    %c1_153 = arith.constant 1 : index
    %c0_154 = arith.constant 0 : index
    %c0_155 = arith.constant 0 : index
    %c0_156 = arith.constant 0 : index
    %c0_157 = arith.constant 0 : index
    %210 = vector.load %arg5[%c1_153, %c0_154, %c0_155, %c0_156, %c0_157] : memref<2x3x2x1x16xf32, #tpu.memory_space<vmem>>, vector<1x1x1x1x16xf32>
    %211 = vector.shape_cast %210 : vector<1x1x1x1x16xf32> to vector<1x16xf32>
    %212 = vector.broadcast %211 : vector<1x16xf32> to vector<8x16xf32>
    %213 = arith.addf %209, %212 : vector<8x16xf32>
    %c1_158 = arith.constant 1 : index
    %c1_159 = arith.constant 1 : index
    %c0_160 = arith.constant 0 : index
    %c0_161 = arith.constant 0 : index
    %c0_162 = arith.constant 0 : index
    %214 = vector.load %arg4[%c1_158, %c1_159, %c0_160, %c0_161, %c0_162] : memref<2x3x2x32x16xf32, #tpu.memory_space<vmem>>, vector<1x1x1x32x16xf32>
    %215 = vector.shape_cast %214 : vector<1x1x1x32x16xf32> to vector<32x16xf32>
    %cst_163 = arith.constant dense<0.000000e+00> : vector<8x16xf32>
    %216 = tpu.matmul %205, %215, %cst_163 {dimension_numbers = #tpu.dot_dimension_numbers<[1], [0], [0], [1], [0, 0, 1, 1], [], []>} : vector<8x32xf32>, vector<32x16xf32>, vector<8x16xf32> -> vector<8x16xf32>
    %c1_164 = arith.constant 1 : index
    %c1_165 = arith.constant 1 : index
    %c0_166 = arith.constant 0 : index
    %c0_167 = arith.constant 0 : index
    %c0_168 = arith.constant 0 : index
    %217 = vector.load %arg5[%c1_164, %c1_165, %c0_166, %c0_167, %c0_168] : memref<2x3x2x1x16xf32, #tpu.memory_space<vmem>>, vector<1x1x1x1x16xf32>
    %218 = vector.shape_cast %217 : vector<1x1x1x1x16xf32> to vector<1x16xf32>
    %219 = vector.broadcast %218 : vector<1x16xf32> to vector<8x16xf32>
    %220 = arith.addf %216, %219 : vector<8x16xf32>
    %c1_169 = arith.constant 1 : index
    %c2_170 = arith.constant 2 : index
    %c0_171 = arith.constant 0 : index
    %c0_172 = arith.constant 0 : index
    %c0_173 = arith.constant 0 : index
    %221 = vector.load %arg4[%c1_169, %c2_170, %c0_171, %c0_172, %c0_173] : memref<2x3x2x32x16xf32, #tpu.memory_space<vmem>>, vector<1x1x1x32x16xf32>
    %222 = vector.shape_cast %221 : vector<1x1x1x32x16xf32> to vector<32x16xf32>
    %cst_174 = arith.constant dense<0.000000e+00> : vector<8x16xf32>
    %223 = tpu.matmul %205, %222, %cst_174 {dimension_numbers = #tpu.dot_dimension_numbers<[1], [0], [0], [1], [0, 0, 1, 1], [], []>} : vector<8x32xf32>, vector<32x16xf32>, vector<8x16xf32> -> vector<8x16xf32>
    %c1_175 = arith.constant 1 : index
    %c2_176 = arith.constant 2 : index
    %c0_177 = arith.constant 0 : index
    %c0_178 = arith.constant 0 : index
    %c0_179 = arith.constant 0 : index
    %224 = vector.load %arg5[%c1_175, %c2_176, %c0_177, %c0_178, %c0_179] : memref<2x3x2x1x16xf32, #tpu.memory_space<vmem>>, vector<1x1x1x1x16xf32>
    %225 = vector.shape_cast %224 : vector<1x1x1x1x16xf32> to vector<1x16xf32>
    %226 = vector.broadcast %225 : vector<1x16xf32> to vector<8x16xf32>
    %227 = arith.addf %223, %226 : vector<8x16xf32>
    %228 = tpu.transpose %220, [1, 0] : vector<8x16xf32> -> vector<16x8xf32>
    %cst_180 = arith.constant dense<0.000000e+00> : vector<8x8xf32>
    %229 = tpu.matmul %213, %228, %cst_180 {dimension_numbers = #tpu.dot_dimension_numbers<[1], [0], [0], [1], [0, 0, 1, 1], [], []>} : vector<8x16xf32>, vector<16x8xf32>, vector<8x8xf32> -> vector<8x8xf32>
    %cst_181 = arith.constant 2.500000e-01 : f32
    %230 = vector.broadcast %cst_181 : f32 to vector<8x8xf32>
    %231 = arith.mulf %229, %230 : vector<8x8xf32>
    %232 = vector.broadcast %3 : vector<1x8xf32> to vector<8x8xf32>
    %233 = arith.addf %231, %232 : vector<8x8xf32>
    %cst_182 = arith.constant dense<0xFF800000> : vector<8xf32>
    %234 = vector.multi_reduction <maximumf>, %233, %cst_182 [1] : vector<8x8xf32> to vector<8xf32>
    %235 = vector.shape_cast %234 : vector<8xf32> to vector<8x1xf32>
    %236 = vector.broadcast %235 : vector<8x1xf32> to vector<8x8xf32>
    %237 = arith.subf %233, %236 : vector<8x8xf32>
    %238 = math.exp %237 : vector<8x8xf32>
    %cst_183 = arith.constant dense<0.000000e+00> : vector<8xf32>
    %239 = vector.multi_reduction <add>, %238, %cst_183 [1] : vector<8x8xf32> to vector<8xf32>
    %240 = vector.shape_cast %239 : vector<8xf32> to vector<8x1xf32>
    %241 = tpu.reciprocal %240 {approx = true} : vector<8x1xf32> -> vector<8x1xf32>
    %242 = vector.broadcast %241 : vector<8x1xf32> to vector<8x8xf32>
    %243 = arith.mulf %238, %242 : vector<8x8xf32>
    %cst_184 = arith.constant dense<0.000000e+00> : vector<8x16xf32>
    %244 = tpu.matmul %243, %227, %cst_184 {dimension_numbers = #tpu.dot_dimension_numbers<[1], [0], [0], [1], [0, 0, 1, 1], [], []>} : vector<8x8xf32>, vector<8x16xf32>, vector<8x16xf32> -> vector<8x16xf32>
    %c1_185 = arith.constant 1 : index
    %c0_186 = arith.constant 0 : index
    %c0_187 = arith.constant 0 : index
    %c0_188 = arith.constant 0 : index
    %245 = vector.load %arg6[%c1_185, %c0_186, %c0_187, %c0_188] : memref<2x2x16x32xf32, #tpu.memory_space<vmem>>, vector<1x1x16x32xf32>
    %246 = vector.shape_cast %245 : vector<1x1x16x32xf32> to vector<16x32xf32>
    %cst_189 = arith.constant dense<0.000000e+00> : vector<8x32xf32>
    %247 = tpu.matmul %244, %246, %cst_189 {dimension_numbers = #tpu.dot_dimension_numbers<[1], [0], [0], [1], [0, 0, 1, 1], [], []>} : vector<8x16xf32>, vector<16x32xf32>, vector<8x32xf32> -> vector<8x32xf32>
    %248 = arith.addf %206, %247 : vector<8x32xf32>
    %c1_190 = arith.constant 1 : index
    %c0_191 = arith.constant 0 : index
    %c1_192 = arith.constant 1 : index
    %c0_193 = arith.constant 0 : index
    %c0_194 = arith.constant 0 : index
    %249 = vector.load %arg4[%c1_190, %c0_191, %c1_192, %c0_193, %c0_194] : memref<2x3x2x32x16xf32, #tpu.memory_space<vmem>>, vector<1x1x1x32x16xf32>
    %250 = vector.shape_cast %249 : vector<1x1x1x32x16xf32> to vector<32x16xf32>
    %cst_195 = arith.constant dense<0.000000e+00> : vector<8x16xf32>
    %251 = tpu.matmul %205, %250, %cst_195 {dimension_numbers = #tpu.dot_dimension_numbers<[1], [0], [0], [1], [0, 0, 1, 1], [], []>} : vector<8x32xf32>, vector<32x16xf32>, vector<8x16xf32> -> vector<8x16xf32>
    %c1_196 = arith.constant 1 : index
    %c0_197 = arith.constant 0 : index
    %c1_198 = arith.constant 1 : index
    %c0_199 = arith.constant 0 : index
    %c0_200 = arith.constant 0 : index
    %252 = vector.load %arg5[%c1_196, %c0_197, %c1_198, %c0_199, %c0_200] : memref<2x3x2x1x16xf32, #tpu.memory_space<vmem>>, vector<1x1x1x1x16xf32>
    %253 = vector.shape_cast %252 : vector<1x1x1x1x16xf32> to vector<1x16xf32>
    %254 = vector.broadcast %253 : vector<1x16xf32> to vector<8x16xf32>
    %255 = arith.addf %251, %254 : vector<8x16xf32>
    %c1_201 = arith.constant 1 : index
    %c1_202 = arith.constant 1 : index
    %c1_203 = arith.constant 1 : index
    %c0_204 = arith.constant 0 : index
    %c0_205 = arith.constant 0 : index
    %256 = vector.load %arg4[%c1_201, %c1_202, %c1_203, %c0_204, %c0_205] : memref<2x3x2x32x16xf32, #tpu.memory_space<vmem>>, vector<1x1x1x32x16xf32>
    %257 = vector.shape_cast %256 : vector<1x1x1x32x16xf32> to vector<32x16xf32>
    %cst_206 = arith.constant dense<0.000000e+00> : vector<8x16xf32>
    %258 = tpu.matmul %205, %257, %cst_206 {dimension_numbers = #tpu.dot_dimension_numbers<[1], [0], [0], [1], [0, 0, 1, 1], [], []>} : vector<8x32xf32>, vector<32x16xf32>, vector<8x16xf32> -> vector<8x16xf32>
    %c1_207 = arith.constant 1 : index
    %c1_208 = arith.constant 1 : index
    %c1_209 = arith.constant 1 : index
    %c0_210 = arith.constant 0 : index
    %c0_211 = arith.constant 0 : index
    %259 = vector.load %arg5[%c1_207, %c1_208, %c1_209, %c0_210, %c0_211] : memref<2x3x2x1x16xf32, #tpu.memory_space<vmem>>, vector<1x1x1x1x16xf32>
    %260 = vector.shape_cast %259 : vector<1x1x1x1x16xf32> to vector<1x16xf32>
    %261 = vector.broadcast %260 : vector<1x16xf32> to vector<8x16xf32>
    %262 = arith.addf %258, %261 : vector<8x16xf32>
    %c1_212 = arith.constant 1 : index
    %c2_213 = arith.constant 2 : index
    %c1_214 = arith.constant 1 : index
    %c0_215 = arith.constant 0 : index
    %c0_216 = arith.constant 0 : index
    %263 = vector.load %arg4[%c1_212, %c2_213, %c1_214, %c0_215, %c0_216] : memref<2x3x2x32x16xf32, #tpu.memory_space<vmem>>, vector<1x1x1x32x16xf32>
    %264 = vector.shape_cast %263 : vector<1x1x1x32x16xf32> to vector<32x16xf32>
    %cst_217 = arith.constant dense<0.000000e+00> : vector<8x16xf32>
    %265 = tpu.matmul %205, %264, %cst_217 {dimension_numbers = #tpu.dot_dimension_numbers<[1], [0], [0], [1], [0, 0, 1, 1], [], []>} : vector<8x32xf32>, vector<32x16xf32>, vector<8x16xf32> -> vector<8x16xf32>
    %c1_218 = arith.constant 1 : index
    %c2_219 = arith.constant 2 : index
    %c1_220 = arith.constant 1 : index
    %c0_221 = arith.constant 0 : index
    %c0_222 = arith.constant 0 : index
    %266 = vector.load %arg5[%c1_218, %c2_219, %c1_220, %c0_221, %c0_222] : memref<2x3x2x1x16xf32, #tpu.memory_space<vmem>>, vector<1x1x1x1x16xf32>
    %267 = vector.shape_cast %266 : vector<1x1x1x1x16xf32> to vector<1x16xf32>
    %268 = vector.broadcast %267 : vector<1x16xf32> to vector<8x16xf32>
    %269 = arith.addf %265, %268 : vector<8x16xf32>
    %270 = tpu.transpose %262, [1, 0] : vector<8x16xf32> -> vector<16x8xf32>
    %cst_223 = arith.constant dense<0.000000e+00> : vector<8x8xf32>
    %271 = tpu.matmul %255, %270, %cst_223 {dimension_numbers = #tpu.dot_dimension_numbers<[1], [0], [0], [1], [0, 0, 1, 1], [], []>} : vector<8x16xf32>, vector<16x8xf32>, vector<8x8xf32> -> vector<8x8xf32>
    %cst_224 = arith.constant 2.500000e-01 : f32
    %272 = vector.broadcast %cst_224 : f32 to vector<8x8xf32>
    %273 = arith.mulf %271, %272 : vector<8x8xf32>
    %274 = vector.broadcast %3 : vector<1x8xf32> to vector<8x8xf32>
    %275 = arith.addf %273, %274 : vector<8x8xf32>
    %cst_225 = arith.constant dense<0xFF800000> : vector<8xf32>
    %276 = vector.multi_reduction <maximumf>, %275, %cst_225 [1] : vector<8x8xf32> to vector<8xf32>
    %277 = vector.shape_cast %276 : vector<8xf32> to vector<8x1xf32>
    %278 = vector.broadcast %277 : vector<8x1xf32> to vector<8x8xf32>
    %279 = arith.subf %275, %278 : vector<8x8xf32>
    %280 = math.exp %279 : vector<8x8xf32>
    %cst_226 = arith.constant dense<0.000000e+00> : vector<8xf32>
    %281 = vector.multi_reduction <add>, %280, %cst_226 [1] : vector<8x8xf32> to vector<8xf32>
    %282 = vector.shape_cast %281 : vector<8xf32> to vector<8x1xf32>
    %283 = tpu.reciprocal %282 {approx = true} : vector<8x1xf32> -> vector<8x1xf32>
    %284 = vector.broadcast %283 : vector<8x1xf32> to vector<8x8xf32>
    %285 = arith.mulf %280, %284 : vector<8x8xf32>
    %cst_227 = arith.constant dense<0.000000e+00> : vector<8x16xf32>
    %286 = tpu.matmul %285, %269, %cst_227 {dimension_numbers = #tpu.dot_dimension_numbers<[1], [0], [0], [1], [0, 0, 1, 1], [], []>} : vector<8x8xf32>, vector<8x16xf32>, vector<8x16xf32> -> vector<8x16xf32>
    %c1_228 = arith.constant 1 : index
    %c1_229 = arith.constant 1 : index
    %c0_230 = arith.constant 0 : index
    %c0_231 = arith.constant 0 : index
    %287 = vector.load %arg6[%c1_228, %c1_229, %c0_230, %c0_231] : memref<2x2x16x32xf32, #tpu.memory_space<vmem>>, vector<1x1x16x32xf32>
    %288 = vector.shape_cast %287 : vector<1x1x16x32xf32> to vector<16x32xf32>
    %cst_232 = arith.constant dense<0.000000e+00> : vector<8x32xf32>
    %289 = tpu.matmul %286, %288, %cst_232 {dimension_numbers = #tpu.dot_dimension_numbers<[1], [0], [0], [1], [0, 0, 1, 1], [], []>} : vector<8x16xf32>, vector<16x32xf32>, vector<8x32xf32> -> vector<8x32xf32>
    %290 = arith.addf %248, %289 : vector<8x32xf32>
    %c1_233 = arith.constant 1 : index
    %c0_234 = arith.constant 0 : index
    %c0_235 = arith.constant 0 : index
    %c0_236 = arith.constant 0 : index
    %291 = vector.load %arg7[%c1_233, %c0_234, %c0_235, %c0_236] : memref<2x6x1x32xf32, #tpu.memory_space<vmem>>, vector<1x1x1x32xf32>
    %292 = vector.shape_cast %291 : vector<1x1x1x32xf32> to vector<1x32xf32>
    %293 = vector.broadcast %292 : vector<1x32xf32> to vector<8x32xf32>
    %294 = arith.addf %290, %293 : vector<8x32xf32>
    %295 = arith.addf %294, %205 : vector<8x32xf32>
    %c1_237 = arith.constant 1 : index
    %c1_238 = arith.constant 1 : index
    %c0_239 = arith.constant 0 : index
    %c0_240 = arith.constant 0 : index
    %296 = vector.load %arg7[%c1_237, %c1_238, %c0_239, %c0_240] : memref<2x6x1x32xf32, #tpu.memory_space<vmem>>, vector<1x1x1x32xf32>
    %297 = vector.shape_cast %296 : vector<1x1x1x32xf32> to vector<1x32xf32>
    %c1_241 = arith.constant 1 : index
    %c2_242 = arith.constant 2 : index
    %c0_243 = arith.constant 0 : index
    %c0_244 = arith.constant 0 : index
    %298 = vector.load %arg7[%c1_241, %c2_242, %c0_243, %c0_244] : memref<2x6x1x32xf32, #tpu.memory_space<vmem>>, vector<1x1x1x32xf32>
    %299 = vector.shape_cast %298 : vector<1x1x1x32xf32> to vector<1x32xf32>
    %cst_245 = arith.constant dense<0.000000e+00> : vector<8xf32>
    %300 = vector.multi_reduction <add>, %295, %cst_245 [1] : vector<8x32xf32> to vector<8xf32>
    %301 = vector.shape_cast %300 : vector<8xf32> to vector<8x1xf32>
    %cst_246 = arith.constant 3.200000e+01 : f32
    %302 = vector.broadcast %cst_246 : f32 to vector<8x1xf32>
    %303 = arith.divf %301, %302 : vector<8x1xf32>
    %304 = vector.broadcast %303 : vector<8x1xf32> to vector<8x32xf32>
    %305 = arith.subf %295, %304 : vector<8x32xf32>
    %306 = vector.broadcast %303 : vector<8x1xf32> to vector<8x32xf32>
    %307 = arith.subf %295, %306 : vector<8x32xf32>
    %308 = arith.mulf %305, %307 : vector<8x32xf32>
    %cst_247 = arith.constant dense<0.000000e+00> : vector<8xf32>
    %309 = vector.multi_reduction <add>, %308, %cst_247 [1] : vector<8x32xf32> to vector<8xf32>
    %310 = vector.shape_cast %309 : vector<8xf32> to vector<8x1xf32>
    %cst_248 = arith.constant 3.200000e+01 : f32
    %311 = vector.broadcast %cst_248 : f32 to vector<8x1xf32>
    %312 = arith.divf %310, %311 : vector<8x1xf32>
    %313 = vector.broadcast %303 : vector<8x1xf32> to vector<8x32xf32>
    %314 = arith.subf %295, %313 : vector<8x32xf32>
    %cst_249 = arith.constant 9.99999996E-13 : f32
    %315 = vector.broadcast %cst_249 : f32 to vector<8x1xf32>
    %316 = arith.addf %312, %315 : vector<8x1xf32>
    %317 = math.rsqrt %316 : vector<8x1xf32>
    %318 = vector.broadcast %317 : vector<8x1xf32> to vector<8x32xf32>
    %319 = arith.mulf %314, %318 : vector<8x32xf32>
    %320 = vector.broadcast %297 : vector<1x32xf32> to vector<8x32xf32>
    %321 = arith.mulf %319, %320 : vector<8x32xf32>
    %322 = vector.broadcast %299 : vector<1x32xf32> to vector<8x32xf32>
    %323 = arith.addf %321, %322 : vector<8x32xf32>
    %c1_250 = arith.constant 1 : index
    %c0_251 = arith.constant 0 : index
    %c0_252 = arith.constant 0 : index
    %324 = vector.load %arg8[%c1_250, %c0_251, %c0_252] : memref<2x32x64xf32, #tpu.memory_space<vmem>>, vector<1x32x64xf32>
    %325 = vector.shape_cast %324 : vector<1x32x64xf32> to vector<32x64xf32>
    %cst_253 = arith.constant dense<0.000000e+00> : vector<8x64xf32>
    %326 = tpu.matmul %323, %325, %cst_253 {dimension_numbers = #tpu.dot_dimension_numbers<[1], [0], [0], [1], [0, 0, 1, 1], [], []>} : vector<8x32xf32>, vector<32x64xf32>, vector<8x64xf32> -> vector<8x64xf32>
    %c1_254 = arith.constant 1 : index
    %c0_255 = arith.constant 0 : index
    %c0_256 = arith.constant 0 : index
    %327 = vector.load %arg9[%c1_254, %c0_255, %c0_256] : memref<2x1x64xf32, #tpu.memory_space<vmem>>, vector<1x1x64xf32>
    %328 = vector.shape_cast %327 : vector<1x1x64xf32> to vector<1x64xf32>
    %329 = vector.broadcast %328 : vector<1x64xf32> to vector<8x64xf32>
    %330 = arith.addf %326, %329 : vector<8x64xf32>
    %cst_257 = arith.constant 5.000000e-01 : f32
    %331 = vector.broadcast %cst_257 : f32 to vector<8x64xf32>
    %332 = arith.mulf %331, %330 : vector<8x64xf32>
    %cst_258 = arith.constant 4.471500e-02 : f32
    %333 = vector.broadcast %cst_258 : f32 to vector<8x64xf32>
    %334 = arith.mulf %333, %330 : vector<8x64xf32>
    %335 = arith.mulf %334, %330 : vector<8x64xf32>
    %336 = arith.mulf %335, %330 : vector<8x64xf32>
    %337 = arith.addf %330, %336 : vector<8x64xf32>
    %cst_259 = arith.constant 0.797884583 : f32
    %338 = vector.broadcast %cst_259 : f32 to vector<8x64xf32>
    %339 = arith.mulf %338, %337 : vector<8x64xf32>
    %340 = math.tanh %339 : vector<8x64xf32>
    %cst_260 = arith.constant 1.000000e+00 : f32
    %341 = vector.broadcast %cst_260 : f32 to vector<8x64xf32>
    %342 = arith.addf %341, %340 : vector<8x64xf32>
    %343 = arith.mulf %332, %342 : vector<8x64xf32>
    %c1_261 = arith.constant 1 : index
    %c0_262 = arith.constant 0 : index
    %c0_263 = arith.constant 0 : index
    %344 = vector.load %arg10[%c1_261, %c0_262, %c0_263] : memref<2x64x32xf32, #tpu.memory_space<vmem>>, vector<1x64x32xf32>
    %345 = vector.shape_cast %344 : vector<1x64x32xf32> to vector<64x32xf32>
    %cst_264 = arith.constant dense<0.000000e+00> : vector<8x32xf32>
    %346 = tpu.matmul %343, %345, %cst_264 {dimension_numbers = #tpu.dot_dimension_numbers<[1], [0], [0], [1], [0, 0, 1, 1], [], []>} : vector<8x64xf32>, vector<64x32xf32>, vector<8x32xf32> -> vector<8x32xf32>
    %c1_265 = arith.constant 1 : index
    %c3_266 = arith.constant 3 : index
    %c0_267 = arith.constant 0 : index
    %c0_268 = arith.constant 0 : index
    %347 = vector.load %arg7[%c1_265, %c3_266, %c0_267, %c0_268] : memref<2x6x1x32xf32, #tpu.memory_space<vmem>>, vector<1x1x1x32xf32>
    %348 = vector.shape_cast %347 : vector<1x1x1x32xf32> to vector<1x32xf32>
    %349 = vector.broadcast %348 : vector<1x32xf32> to vector<8x32xf32>
    %350 = arith.addf %346, %349 : vector<8x32xf32>
    %351 = arith.addf %350, %323 : vector<8x32xf32>
    %c1_269 = arith.constant 1 : index
    %c4_270 = arith.constant 4 : index
    %c0_271 = arith.constant 0 : index
    %c0_272 = arith.constant 0 : index
    %352 = vector.load %arg7[%c1_269, %c4_270, %c0_271, %c0_272] : memref<2x6x1x32xf32, #tpu.memory_space<vmem>>, vector<1x1x1x32xf32>
    %353 = vector.shape_cast %352 : vector<1x1x1x32xf32> to vector<1x32xf32>
    %c1_273 = arith.constant 1 : index
    %c5_274 = arith.constant 5 : index
    %c0_275 = arith.constant 0 : index
    %c0_276 = arith.constant 0 : index
    %354 = vector.load %arg7[%c1_273, %c5_274, %c0_275, %c0_276] : memref<2x6x1x32xf32, #tpu.memory_space<vmem>>, vector<1x1x1x32xf32>
    %355 = vector.shape_cast %354 : vector<1x1x1x32xf32> to vector<1x32xf32>
    %cst_277 = arith.constant dense<0.000000e+00> : vector<8xf32>
    %356 = vector.multi_reduction <add>, %351, %cst_277 [1] : vector<8x32xf32> to vector<8xf32>
    %357 = vector.shape_cast %356 : vector<8xf32> to vector<8x1xf32>
    %cst_278 = arith.constant 3.200000e+01 : f32
    %358 = vector.broadcast %cst_278 : f32 to vector<8x1xf32>
    %359 = arith.divf %357, %358 : vector<8x1xf32>
    %360 = vector.broadcast %359 : vector<8x1xf32> to vector<8x32xf32>
    %361 = arith.subf %351, %360 : vector<8x32xf32>
    %362 = vector.broadcast %359 : vector<8x1xf32> to vector<8x32xf32>
    %363 = arith.subf %351, %362 : vector<8x32xf32>
    %364 = arith.mulf %361, %363 : vector<8x32xf32>
    %cst_279 = arith.constant dense<0.000000e+00> : vector<8xf32>
    %365 = vector.multi_reduction <add>, %364, %cst_279 [1] : vector<8x32xf32> to vector<8xf32>
    %366 = vector.shape_cast %365 : vector<8xf32> to vector<8x1xf32>
    %cst_280 = arith.constant 3.200000e+01 : f32
    %367 = vector.broadcast %cst_280 : f32 to vector<8x1xf32>
    %368 = arith.divf %366, %367 : vector<8x1xf32>
    %369 = vector.broadcast %359 : vector<8x1xf32> to vector<8x32xf32>
    %370 = arith.subf %351, %369 : vector<8x32xf32>
    %cst_281 = arith.constant 9.99999996E-13 : f32
    %371 = vector.broadcast %cst_281 : f32 to vector<8x1xf32>
    %372 = arith.addf %368, %371 : vector<8x1xf32>
    %373 = math.rsqrt %372 : vector<8x1xf32>
    %374 = vector.broadcast %373 : vector<8x1xf32> to vector<8x32xf32>
    %375 = arith.mulf %370, %374 : vector<8x32xf32>
    %376 = vector.broadcast %353 : vector<1x32xf32> to vector<8x32xf32>
    %377 = arith.mulf %375, %376 : vector<8x32xf32>
    %378 = vector.broadcast %355 : vector<1x32xf32> to vector<8x32xf32>
    %379 = arith.addf %377, %378 : vector<8x32xf32>
    %380 = vector.extract_strided_slice %379 {offsets = [0, 0], sizes = [1, 32], strides = [1, 1]} : vector<8x32xf32> to vector<1x32xf32>
    %c0_282 = arith.constant 0 : index
    %c0_283 = arith.constant 0 : index
    %381 = vector.load %arg11[%c0_282, %c0_283] : memref<32x32xf32, #tpu.memory_space<vmem>>, vector<32x32xf32>
    %cst_284 = arith.constant dense<0.000000e+00> : vector<1x32xf32>
    %382 = tpu.matmul %380, %381, %cst_284 {dimension_numbers = #tpu.dot_dimension_numbers<[1], [0], [0], [1], [0, 0, 1, 1], [], []>} : vector<1x32xf32>, vector<32x32xf32>, vector<1x32xf32> -> vector<1x32xf32>
    %c0_285 = arith.constant 0 : index
    %c0_286 = arith.constant 0 : index
    %383 = vector.load %arg12[%c0_285, %c0_286] : memref<1x32xf32, #tpu.memory_space<vmem>>, vector<1x32xf32>
    %384 = arith.addf %382, %383 : vector<1x32xf32>
    %385 = math.tanh %384 : vector<1x32xf32>
    %c0_287 = arith.constant 0 : index
    %c0_288 = arith.constant 0 : index
    %386 = vector.load %arg13[%c0_287, %c0_288] : memref<32x3xf32, #tpu.memory_space<vmem>>, vector<32x3xf32>
    %cst_289 = arith.constant dense<0.000000e+00> : vector<1x3xf32>
    %387 = tpu.matmul %385, %386, %cst_289 {dimension_numbers = #tpu.dot_dimension_numbers<[1], [0], [0], [1], [0, 0, 1, 1], [], []>} : vector<1x32xf32>, vector<32x3xf32>, vector<1x3xf32> -> vector<1x3xf32>
    %c0_290 = arith.constant 0 : index
    %c0_291 = arith.constant 0 : index
    %388 = vector.load %arg14[%c0_290, %c0_291] : memref<1x3xf32, #tpu.memory_space<vmem>>, vector<1x3xf32>
    %389 = arith.addf %387, %388 : vector<1x3xf32>
    %c0_292 = arith.constant 0 : index
    %c0_293 = arith.constant 0 : index
    %c0_294 = arith.constant 0 : index
    %390 = vector.load %arg15[%c0_292, %c0_293, %c0_294] : memref<1x1x3xf32, #tpu.memory_space<vmem>>, vector<1x1x3xf32>
    %391 = vector.shape_cast %390 : vector<1x1x3xf32> to vector<1x3xf32>
    %392 = vector.shape_cast %389 : vector<1x3xf32> to vector<1x1x3xf32>
    tpu.vector_store %arg15[%c0_292, %c0_293, %c0_294], %392 {strides = array<i32>} : memref<1x1x3xf32, #tpu.memory_space<vmem>>, vector<1x1x3xf32>,
    return
  }
  func.func @transform_0(%arg0: i32) -> (i32, i32, i32) {
    %c0_i32 = arith.constant 0 : i32
    %c0_i32_0 = arith.constant 0 : i32
    %c0_i32_1 = arith.constant 0 : i32
    return %arg0, %c0_i32, %c0_i32_0 : i32, i32, i32
  }
  func.func @transform_1(%arg0: i32) -> (i32, i32, i32) {
    %c0_i32 = arith.constant 0 : i32
    %c0_i32_0 = arith.constant 0 : i32
    %c0_i32_1 = arith.constant 0 : i32
    return %arg0, %c0_i32, %c0_i32_0 : i32, i32, i32
  }
  func.func @transform_2(%arg0: i32) -> (i32, i32, i32) {
    %c0_i32 = arith.constant 0 : i32
    %c0_i32_0 = arith.constant 0 : i32
    %c0_i32_1 = arith.constant 0 : i32
    %c0_i32_2 = arith.constant 0 : i32
    return %c0_i32, %c0_i32_0, %c0_i32_1 : i32, i32, i32
  }
  func.func @transform_3(%arg0: i32) -> (i32, i32, i32, i32, i32) {
    %c0_i32 = arith.constant 0 : i32
    %c0_i32_0 = arith.constant 0 : i32
    %c0_i32_1 = arith.constant 0 : i32
    %c0_i32_2 = arith.constant 0 : i32
    %c0_i32_3 = arith.constant 0 : i32
    %c0_i32_4 = arith.constant 0 : i32
    return %c0_i32, %c0_i32_0, %c0_i32_1, %c0_i32_2, %c0_i32_3 : i32, i32, i32, i32, i32
  }
  func.func @transform_4(%arg0: i32) -> (i32, i32, i32, i32, i32) {
    %c0_i32 = arith.constant 0 : i32
    %c0_i32_0 = arith.constant 0 : i32
    %c0_i32_1 = arith.constant 0 : i32
    %c0_i32_2 = arith.constant 0 : i32
    %c0_i32_3 = arith.constant 0 : i32
    %c0_i32_4 = arith.constant 0 : i32
    return %c0_i32, %c0_i32_0, %c0_i32_1, %c0_i32_2, %c0_i32_3 : i32, i32, i32, i32, i32
  }
  func.func @transform_5(%arg0: i32) -> (i32, i32, i32, i32) {
    %c0_i32 = arith.constant 0 : i32
    %c0_i32_0 = arith.constant 0 : i32
    %c0_i32_1 = arith.constant 0 : i32
    %c0_i32_2 = arith.constant 0 : i32
    %c0_i32_3 = arith.constant 0 : i32
    return %c0_i32, %c0_i32_0, %c0_i32_1, %c0_i32_2 : i32, i32, i32, i32
  }
  func.func @transform_6(%arg0: i32) -> (i32, i32, i32, i32) {
    %c0_i32 = arith.constant 0 : i32
    %c0_i32_0 = arith.constant 0 : i32
    %c0_i32_1 = arith.constant 0 : i32
    %c0_i32_2 = arith.constant 0 : i32
    %c0_i32_3 = arith.constant 0 : i32
    return %c0_i32, %c0_i32_0, %c0_i32_1, %c0_i32_2 : i32, i32, i32, i32
  }
  func.func @transform_7(%arg0: i32) -> (i32, i32, i32) {
    %c0_i32 = arith.constant 0 : i32
    %c0_i32_0 = arith.constant 0 : i32
    %c0_i32_1 = arith.constant 0 : i32
    %c0_i32_2 = arith.constant 0 : i32
    return %c0_i32, %c0_i32_0, %c0_i32_1 : i32, i32, i32
  }
  func.func @transform_8(%arg0: i32) -> (i32, i32, i32) {
    %c0_i32 = arith.constant 0 : i32
    %c0_i32_0 = arith.constant 0 : i32
    %c0_i32_1 = arith.constant 0 : i32
    %c0_i32_2 = arith.constant 0 : i32
    return %c0_i32, %c0_i32_0, %c0_i32_1 : i32, i32, i32
  }
  func.func @transform_9(%arg0: i32) -> (i32, i32, i32) {
    %c0_i32 = arith.constant 0 : i32
    %c0_i32_0 = arith.constant 0 : i32
    %c0_i32_1 = arith.constant 0 : i32
    %c0_i32_2 = arith.constant 0 : i32
    return %c0_i32, %c0_i32_0, %c0_i32_1 : i32, i32, i32
  }
  func.func @transform_10(%arg0: i32) -> (i32, i32) {
    %c0_i32 = arith.constant 0 : i32
    %c0_i32_0 = arith.constant 0 : i32
    %c0_i32_1 = arith.constant 0 : i32
    return %c0_i32, %c0_i32_0 : i32, i32
  }
  func.func @transform_11(%arg0: i32) -> (i32, i32) {
    %c0_i32 = arith.constant 0 : i32
    %c0_i32_0 = arith.constant 0 : i32
    %c0_i32_1 = arith.constant 0 : i32
    return %c0_i32, %c0_i32_0 : i32, i32
  }
  func.func @transform_12(%arg0: i32) -> (i32, i32) {
    %c0_i32 = arith.constant 0 : i32
    %c0_i32_0 = arith.constant 0 : i32
    %c0_i32_1 = arith.constant 0 : i32
    return %c0_i32, %c0_i32_0 : i32, i32
  }
  func.func @transform_13(%arg0: i32) -> (i32, i32) {
    %c0_i32 = arith.constant 0 : i32
    %c0_i32_0 = arith.constant 0 : i32
    %c0_i32_1 = arith.constant 0 : i32
    return %c0_i32, %c0_i32_0 : i32, i32
  }
  func.func @transform_14(%arg0: i32) -> (i32, i32, i32) {
    %c0_i32 = arith.constant 0 : i32
    %c0_i32_0 = arith.constant 0 : i32
    %c0_i32_1 = arith.constant 0 : i32
    return %arg0, %c0_i32, %c0_i32_0 : i32, i32, i32
  }
}

</mosaic_0001>

<bundles_post_ra>
// kernel: bert_forward.1
= control target key start
LH: loop header
LB: loop body
LE: loop exit
PB: predicated region body
PF: predicated region fallthrough
CT: control target
= control target key end

     0   :  { %s2591_s0 = inlined_call_operand.vmem [shape: f32[2,8,32], index: 0, kind: input, shape index: {}]   ;;  %s2592_s1 = inlined_call_operand.vmem [shape: f32[2,1,8], index: 1, kind: input, shape index: {}]   ;;  %s2593_s2 = inlined_call_operand.vmem [shape: f32[2,1,32], index: 2, kind: input, shape index: {}]   ;;  %s2594_s3 = inlined_call_operand.vmem [shape: f32[2,3,2,32,16], index: 3, kind: input, shape index: {}]   ;;  %s2595_s4 = inlined_call_operand.vmem [shape: f32[2,3,2,1,16], index: 4, kind: input, shape index: {}]   ;;  %s2596_s5 = inlined_call_operand.vmem [shape: f32[2,2,16,32], index: 5, kind: input, shape index: {}]   ;;  %s2597_s6 = inlined_call_operand.vmem [shape: f32[2,6,1,32], index: 6, kind: input, shape index: {}]   ;;  %s2598_s7 = inlined_call_operand.vmem [shape: f32[2,32,64], index: 7, kind: input, shape index: {}]   ;;  %s2599_s8 = inlined_call_operand.vmem [shape: f32[2,1,64], index: 8, kind: input, shape index: {}]   ;;  %s2600_s9 = inlined_call_operand.vmem [shape: f32[2,64,32], index: 9, kind: input, shape index: {}]   ;;  %s2601_s10 = inlined_call_operand.vmem [shape: f32[32,32], index: 10, kind: input, shape index: {}]   ;;  %s2602_s11 = inlined_call_operand.vmem [shape: f32[1,32], index: 11, kind: input, shape index: {}]   ;;  %s2603_s12 = inlined_call_operand.vmem [shape: f32[32,3], index: 12, kind: input, shape index: {}]   ;;  %s2604_s13 = inlined_call_operand.vmem [shape: f32[1,3], index: 13, kind: input, shape index: {}]   ;;  %s2605_s14 = inlined_call_operand.hbm [shape: f32[2,1,3], index: 14, kind: output, shape index: {}]  }
   0x1   :  { %2609 = sst [smem:[#allocation8_spill]] %s2591_s0 }
   0x2   :  { %2610 = sst [smem:[#allocation9_spill]] %s2592_s1 }
   0x3   :  { %19 = vsyncpa [#allocation3], 0 }
   0x4   :  { %21 = vsyncpa [#allocation3 + $0x1], 0  ;;  %s2052_s29 = smov 0   ;;  %s2054_s30 = smov 0  }
   0x5   :  { %s2056_s15 = smov 0   ;;  %s2058_s16 = smov 0  }
   0x6 LB: > { %2611 = sst [smem:[#allocation5_spill]] %s1970_s15  ;;  %s2073_s17 = sadd.s32 4294967295, %s1974_s16   ;;  %s1974_s16 = sphi %s2058_s16, %s2619_s16   ;;  %s1970_s15 = sphi %s2056_s15, %s2621_s15   ;;  %s1966_s30 = sphi %s2054_s30, %s2623_s30   ;;  %s1962_s29 = sphi %s2052_s29, %s2622_s29  }
   0x7   : > { %s1682_s18 = sadd.s32 4294967294, %s1974_s16   ;;  %s2077_s19 = sadd.s32 1, %s1974_s16  }
   0x8   : > { %2612 = sst [smem:[#allocation6_spill]] %s2077_s19  ;;  %s338_s20 = sadd.s32 1, %s1970_s15 }
   0x9   : > { %s335_s21 = ssub.s32 %s1974_s16, %s2077_s19  ;;  %p348_p0 = scmp.ne.s32.totalorder %s1970_s15, %s1966_s30 }
   0xa   : > { %p336_p1 = scmp.eq.s32.totalorder %s335_s21, 0  ;;  %p349_p2 = scmp.eq.s32.totalorder %s2073_s17, 1 }
   0xb   : > { %p354_p3 = scmp.ne.s32.totalorder %s1966_s30, %s1962_s29  ;;  %p355_p4 = scmp.eq.s32.totalorder %s1682_s18, 1 }
   0xc   : > { %s2088_s22 = scalar_select %p336_p1, %s1970_s15, %s338_s20  }
   0xd   : > { %p2090_p5 = por %p349_p2, %p348_p0  ;;  %p2094_p6 = por %p355_p4, %p354_p3 }
   0xe   : > { %2613 = sst [smem:[#allocation7_spill]] %s2088_s22  ;;  %p1685_p7 = scmp.ge.s32.totalorder %s1974_s16, 1 }
   0xf   : > { %p422_p8 = scmp.lt.s32.totalorder %s1974_s16, 3 }
  0x11   : > { %p423_p9 = pnand %p1685_p7, %p422_p8 }
  0x12   : > { %p469_p10 = scmp.lt.s32.totalorder (!%p423_p9), %s2073_s17, 1  ;;  %s2616_s1 = sld [smem:[#allocation9_spill]] (!%p423_p9) }
  0x13   : > { %426 = sbr.rel (%p423_p9) target bundleno = 4571 (0x11db), region = 76  ;;  %s2617_s0 = sld [smem:[#allocation8_spill]] (!%p423_p9) }
  0x14   : > { %s1614_s20 = scalar_lea.hbm (!%p423_p9), %s2605_s14, %s2073_s17  ;;  %s1932_s28 = scalar_lea.hbm (!%p423_p9), %s2605_s14, 2 }
  0x15   : > { %s1618_s15 = sshll.u32 (!%p423_p9), %s1614_s20, 4  ;;  %s1619_s15 = int_to_ptr.hbm [resolvable:$true] %s1618_s15 }
  0x18   : > { %s2102_s25 = scalar_select %p469_p10, %s2073_s17, 1  ;;  %vm481_vm0 = vcmask 261120   ;;  %v1976_v2 = vmov 32.0   ;;  %v522_v14 = vld [vmem:[%s2594_s3 + $0x18] sm:$0xff]  ;;  %v521_v17 = vld [vmem:[%s2594_s3 + $0x10] sm:$0xff]  ;;  %v520_v20 = vld [vmem:[%s2594_s3 + $0x8] sm:$0xff] }
  0x19   : > { %1878 = vrcp.f32 %v1976_v2  ;;  %v1692_v15 = vld [vmem:[%s2594_s3 + $0x58] sm:$0xff]  ;;  %542 = vmatpush.msra.mxu0 %v522_v14  ;;  %v1691_v18 = vld [vmem:[%s2594_s3 + $0x50] sm:$0xff]  ;;  %v1690_v21 = vld [vmem:[%s2594_s3 + $0x48] sm:$0xff]  ;;  %vm610_vm5 = vcmask 130048   ;;  %vm642_vm6 = vcmask 64512   ;;  %vm973_vm10 = vcmask 523264  }
  0x1a   : > { %s1686_s26 = sshll.u32 %s2102_s25, 3  ;;  %v1698_v16 = vld [vmem:[%s2594_s3 + $0x98] sm:$0xff]  ;;  %572 = vmatpush.msra.mxu1 %v1692_v15  ;;  %v1697_v19 = vld [vmem:[%s2594_s3 + $0x90] sm:$0xff]  ;;  %v1696_v22 = vld [vmem:[%s2594_s3 + $0x88] sm:$0xff]  ;;  %s2618_s27 = scalar_lea.vmem %s2616_s1, %s2102_s25 }
  0x1b   : > { %s472_s22 = scalar_lea.vmem %s2617_s0, %s1686_s26  ;;  %602 = vmatpush.msra.mxu2 %v1698_v16  ;;  %543 = vmatpush.msra.mxu0 %v521_v17  ;;  %v519_v23 = vld [vmem:[%s2594_s3] sm:$0xff]  ;;  %v1707_v26 = vld [vmem:[%s2594_s3 + $0x38] sm:$0xff]  ;;  %v1706_v28 = vld [vmem:[%s2594_s3 + $0x30] sm:$0xff]  ;;  %s467_s26 = sand.u32 1, %s1966_s30  }
  0x1c   : > { %v476_v0 = vld [vmem:[%s472_s22] sm:$0xff]  ;;  %573 = vmatpush.msra.mxu1 %v1691_v18  ;;  %v1713_v27 = vld [vmem:[%s2594_s3 + $0x78] sm:$0xff]  ;;  %v1712_v29 = vld [vmem:[%s2594_s3 + $0x70] sm:$0xff]  ;;  %s468_s0 = scalar_lea.vmem [#allocation2], %s467_s26  ;;  %s1606_s19 = scalar_lea.sflag [#allocation3], %s467_s26 }
  0x1d   : > { %v482_v1 = vsel %vm481_vm0, %v476_v0, 0.0  ;;  %603 = vmatpush.msra.mxu2 %v1697_v19  ;;  %544 = vmatpush.msra.mxu0 %v520_v20  ;;  %v1689_v24 = vld [vmem:[%s2594_s3 + $0x40] sm:$0xff]  ;;  %v1705_v31 = vld [vmem:[%s2594_s3 + $0x28] sm:$0xff]  ;;  %v1719_v54 = vld [vmem:[%s2594_s3 + $0xb8] sm:$0xff]  ;;  %s1616_s18 = sshll.u32 %s468_s0, 4  ;;  %s1926_s22 = sshra.s32 %s1619_s15, 4  ;;  %s1617_s18 = int_to_ptr.vmem [resolvable:$true] %s1616_s18  ;;  %s1927_s22 = int_to_ptr.hbm [resolvable:$true] %s1926_s22 }
  0x1e   : > { %483 = vadd.xlane.f32.xlu0 %v482_v1  ;;  %574 = vmatpush.msra.mxu1 %v1690_v21  ;;  %v1695_v25 = vld [vmem:[%s2594_s3 + $0x80] sm:$0xff]  ;;  %v1711_v32 = vld [vmem:[%s2594_s3 + $0x68] sm:$0xff]  ;;  %v1718_v57 = vld [vmem:[%s2594_s3 + $0xb0] sm:$0xff]  ;;  %s1928_s1 = scalar_lea.hbm %s1927_s22, 1  ;;  %p1933_p0 = scmp.lt.s32.totalorder %s1927_s22, %s2605_s14 }
  0x1f   : > { %v1879_v3 = vpop.eup %1878  ;;  %604 = vmatpush.msra.mxu2 %v1696_v22  ;;  %545 = vmatpush.msra.mxu0 %v519_v23  ;;  %v1704_v34 = vld [vmem:[%s2594_s3 + $0x20] sm:$0xff]  ;;  %v1717_v59 = vld [vmem:[%s2594_s3 + $0xa8] sm:$0xff]  ;;  %p1929_p11 = scmp.ne.s32.totalorder %s1927_s22, %s1928_s1  ;;  %p1934_p1 = scmp.lt.s32.totalorder %s1932_s28, %s1928_s1 }
  0x20   : > { %v486_v4 = vmul.f32 32.0, %v1879_v3  ;;  %vm490_vm1 = vweird.f32 %v1879_v3  ;;  %575 = vmatpush.msra.mxu1 %v1689_v24  ;;  %v1710_v35 = vld [vmem:[%s2594_s3 + $0x60] sm:$0xff]  ;;  %v678_v15 = vld [vmem:[%s2596_s5 + $0x8] sm:$0xff] }
  0x21   : > { %605 = vmatpush.msra.mxu2 %v1695_v25  ;;  %701 = vmatpush.msrb.mxu0 %v1707_v26  ;;  %v1850_v43 = vld [vmem:[%s2593_s2] ss:$0 sm:$0xff]  ;;  %v1851_v45 = vld [vmem:[%s2593_s2 + $0x1] ss:$0 sm:$0xff]  ;;  %v1853_v49 = vld [vmem:[%s2595_s4 + $0x2] ss:$0 sm:$0xff]  ;;  %p1930_p12 = pnand %p1929_p11, %p2090_p5  ;;  %p1935_p2 = por %p1934_p1, %p1933_p0 }
  0x22   : > { %v487_v5 = vsub.f32 1.0, %v486_v4  ;;  %731 = vmatpush.msrb.mxu1 %v1713_v27  ;;  %v1852_v50 = vld [vmem:[%s2595_s4] ss:$0 sm:$0xff]  ;;  %v1856_v56 = vld [vmem:[%s2595_s4 + $0x4] ss:$0 sm:$0xff] }
  0x23   : > { %702 = vmatpush.msrb.mxu0 %v1706_v28  ;;  %v1855_v58 = vld [vmem:[%s2595_s4 + $0x3] ss:$0 sm:$0xff]  ;;  %v2230_v1 = vld [vmem:[%s2618_s27] ss:$0 sm:$0xff]  ;;  %v1854_v19 = vld [vmem:[%s2595_s4 + $0x1] ss:$0 sm:$0xff]  ;;  %p1931_p13 = pneg %p1930_p12 }
  0x24   : > { %v488_v6 = vmul.f32 %v1879_v3, %v487_v5  ;;  %732 = vmatpush.msrb.mxu1 %v1712_v29  ;;  %v1716_v63 = vld [vmem:[%s2594_s3 + $0xa0] sm:$0xff] }
  0x25   : > { %703 = vmatpush.msrb.mxu0 %v1705_v31  ;;  %v677_v22 = vld [vmem:[%s2596_s5] sm:$0xff]  ;;  %p1936_p3 = pnand %p1935_p2, %p1931_p13 }
  0x26   : > { %v489_v7 = vadd.f32 %v1879_v3, %v488_v6  ;;  %733 = vmatpush.msrb.mxu1 %v1711_v32  ;;  %v1857_v6 = vld [vmem:[%s2595_s4 + $0x5] ss:$0 sm:$0xff] }
  0x27   : > { %704 = vmatpush.msrb.mxu0 %v1704_v34 }
  0x28   : > { %v2113_v8 = vsel %vm490_vm1, %v1879_v3, %v489_v7  ;;  %734 = vmatpush.msrb.mxu1 %v1710_v35 }
  0x91   : > { %v484_v9 = vpop.xlane.xlu0 %483 }
  0x92   : > { %v492_v10 = vmul.f32 %v2113_v8, %v484_v9 }
  0x94   : > { %v493_v11 = vsub.f32 %v476_v0, %v492_v10 }
  0x96   : > { %v494_v12 = vmul.f32 %v493_v11, %v493_v11 }
  0x98   : > { %v495_v13 = vsel %vm481_vm0, %v494_v12, 0.0 }
  0x99   : > { %496 = vadd.xlane.f32.xlu0 %v495_v13 }
 0x10c   : > { %v497_v30 = vpop.xlane.xlu0 %496 }
 0x10d   : > { %v498_v33 = vmul.f32 %v497_v30, %v2113_v8 }
 0x10f   : > { %v499_v36 = vadd.f32 1e-12, %v498_v33  ;;  %v1726_v33 = vld [vmem:[%s2596_s5 + $0x18] sm:$0xff] }
 0x111   : > { %1880 = vrsqrt.f32 %v499_v36  ;;  %vm506_vm3 = vweird.f32 %v499_v36 }
 0x117   : > { %v1881_v37 = vpop.eup %1880 }
 0x118   : > { %v501_v38 = vmul.f32 %v1881_v37, %v499_v36  ;;  %vm507_vm2 = vweird.f32 %v1881_v37 }
 0x119   : > { %vm508_vm4 = vmor %vm506_vm3, %vm507_vm2 }
 0x11a   : > { %v502_v39 = vmul.f32 %v1881_v37, %v501_v38 }
 0x11c   : > { %v503_v40 = vmul.f32 0.5, %v502_v39  ;;  %v1858_v39 = vld [vmem:[%s2597_s6] ss:$0 sm:$0xff] }
 0x11e   : > { %v504_v41 = vsub.f32 1.5, %v503_v40 }
 0x120   : > { %v505_v42 = vmul.f32 %v1881_v37, %v504_v41 }
 0x122   : > { %v509_v44 = vsel %vm508_vm4, %v1881_v37, %v505_v42  ;;  %v1725_v37 = vld [vmem:[%s2596_s5 + $0x10] sm:$0xff] }
 0x123   : > { %v510_v46 = vmul.f32 %v509_v44, %v493_v11 }
 0x125   : > { %v514_v47 = vmul.f32 %v1850_v43, %v510_v46 }
 0x127   : > { %v2184_v48 = vadd.f32 %v1851_v45, %v514_v47 }
 0x129   : > { %1688 = vmatmul.msk.f32.vlgmr.msra.gmra.mxu0 %vm481_vm0, %v2184_v48  ;;  %1694 = vmatmul.msk.f32.vlgmr.msra.gmra.mxu1 %vm481_vm0, %v2184_v48 }
 0x12a   : > { %1700 = vmatmul.msk.f32.vlgmr.msra.gmra.mxu2 %vm481_vm0, %v2184_v48  ;;  %851 = vmatpush.msra.mxu1 %v1726_v33 }
 0x12c   : > { %852 = vmatpush.msra.mxu1 %v1725_v37 }
 0x131   : > { %1709 = vmatmul.msk.f32.vlgmr.msrb.gmra.mxu0 %vm481_vm0, %v2184_v48  ;;  %1715 = vmatmul.msk.f32.vlgmr.msrb.gmra.mxu1 %vm481_vm0, %v2184_v48 }
 0x1a6   : > { %v577_v51 = vpop.f32.mrf.mxu1  ;;  %v547_v52 = vpop.f32.mrf.mxu0 }
 0x1a7   : > { %v578_v53 = vadd.f32 %v1853_v49, %v577_v51  ;;  %v548_v55 = vadd.f32 %v1852_v50, %v547_v52  ;;  %v923_v52 = vld [vmem:[%s2598_s7 + $0x18] sm:$0xff] }
 0x1a9   : > { %1701 = vmatpush.xpose.msk.msrb.mxu2 %vm610_vm5, %v578_v53  ;;  %v921_v53 = vld [vmem:[%s2598_s7 + $0x8] sm:$0xff] }
 0x1ac   : > { %1702 = vmatmul.msk.f32.vlgmr.msrb.gmra.mxu2 %vm610_vm5, %v548_v55 }
 0x1ad   : > { %761 = vmatpush.msra.mxu2 %v1719_v54  ;;  %v607_v60 = vpop.f32.mrf.mxu2  ;;  %v920_v54 = vld [vmem:[%s2598_s7] sm:$0xff] }
 0x1ae   : > { %v736_v61 = vpop.f32.mrf.mxu1  ;;  %v608_v62 = vadd.f32 %v1856_v56, %v607_v60  ;;  %v706_v20 = vpop.f32.mrf.mxu0 }
 0x1af   : > { %762 = vmatpush.msra.mxu2 %v1718_v57  ;;  %v737_v0 = vadd.f32 %v1855_v58, %v736_v61  ;;  %v707_v21 = vadd.f32 %v1854_v19, %v706_v20 }
 0x1b0   : > { %672 = vmatpush.msra.mxu3 %v608_v62 }
 0x1b1   : > { %763 = vmatpush.msra.mxu2 %v1717_v59 }
 0x1b2   : > { %1722 = vmatpush.xpose.msk.msrb.mxu3 %vm610_vm5, %v737_v0  ;;  %v1859_v0 = vld [vmem:[%s2597_s6 + $0x1] ss:$0 sm:$0xff] }
 0x1b3   : > { %764 = vmatpush.msra.mxu2 %v1716_v63 }
 0x1b4   : > { %1721 = vmatmul.msk.f32.vlgmr.msra.gmra.mxu2 %vm481_vm0, %v2184_v48 }
 0x1b5   : > { %874 = vmatpush.msrb.mxu2 %v678_v15  ;;  %v960_v15 = vld [vmem:[%s2600_s9] sm:$0xff] }
 0x1b7   : > { %875 = vmatpush.msrb.mxu2 %v677_v22 }
 0x22f   : > { %v634_v2 = vpop.f32.mrf.mxu2 }
 0x230   : > { %v637_v3 = vmul.f32 0.25, %v634_v2 }
 0x232   : > { %v641_v4 = vadd.f32 %v2230_v1, %v637_v3 }
 0x234   : > { %v643_v5 = vsel %vm642_vm6, %v641_v4, -inf }
 0x235   : > { %644 = vmax.xlane.f32.xlu1 %v643_v5 }
 0x237   : > { %v766_v7 = vpop.f32.mrf.mxu2 }
 0x238   : > { %v767_v9 = vadd.f32 %v1857_v6, %v766_v7  ;;  %v967_v7 = vld [vmem:[%s2600_s9 + $0x38] sm:$0xff] }
 0x23a   : > { %826 = vmatpush.msra.mxu0 %v767_v9  ;;  %v966_v9 = vld [vmem:[%s2600_s9 + $0x30] sm:$0xff] }
 0x23c   : > { %985 = vmatpush.msrb.mxu0 %v967_v7 }
 0x23e   : > { %986 = vmatpush.msrb.mxu0 %v966_v9 }
 0x2a8   : > { %v645_v10 = vpop.xlane.xlu1 %644 }
 0x2a9   : > { %v646_v11 = vsub.f32 %v641_v4, %v645_v10  ;;  %v1860_v4 = vld [vmem:[%s2597_s6 + $0x2] ss:$0 sm:$0xff]  ;;  %v965_v10 = vld [vmem:[%s2600_s9 + $0x28] sm:$0xff] }
 0x2aa   : > { %987 = vmatpush.msrb.mxu0 %v965_v10 }
 0x2ab   : > { %v647_v12 = vmul.f32 1.442695, %v646_v11  ;;  %v964_v11 = vld [vmem:[%s2600_s9 + $0x20] sm:$0xff] }
 0x2ac   : > { %988 = vmatpush.msrb.mxu0 %v964_v11  ;;  %v1867_v11 = vld [vmem:[%s2595_s4 + $0x8] ss:$0 sm:$0xff] }
 0x2ad   : > { %1882 = vpow2.f32 %v647_v12  ;;  %v963_v12 = vld [vmem:[%s2600_s9 + $0x18] sm:$0xff] }
 0x2ae   : > { %989 = vmatpush.msrb.mxu0 %v963_v12  ;;  %v1868_v12 = vld [vmem:[%s2595_s4 + $0xa] ss:$0 sm:$0xff] }
 0x2b3   : > { %v1883_v13 = vpop.eup %1882 }
 0x2b4   : > { %v649_v14 = vsel %vm642_vm6, %v1883_v13, 0.0 }
 0x2b5   : > { %650 = vadd.xlane.f32.xlu1 %v649_v14  ;;  %v961_v14 = vld [vmem:[%s2600_s9 + $0x8] sm:$0xff] }
 0x328   : > { %v651_v16 = vpop.xlane.xlu1 %650 }
 0x329   : > { %1884 = vrcp.f32 %v651_v16  ;;  %v1861_v16 = vld [vmem:[%s2599_s8] ss:$0 sm:$0xff] }
 0x32f   : > { %v1885_v17 = vpop.eup %1884 }
 0x330   : > { %v653_v18 = vmul.f32 %v1885_v17, %v1883_v13  ;;  %v962_v13 = vld [vmem:[%s2600_s9 + $0x10] sm:$0xff] }
 0x331   : > { %990 = vmatpush.msrb.mxu0 %v962_v13  ;;  %v1866_v13 = vld [vmem:[%s2595_s4 + $0x9] ss:$0 sm:$0xff] }
 0x332   : > { %1703 = vmatmul.msk.f32.vlgmr.msra.gmra.mxu3 %vm642_vm6, %v653_v18 }
 0x333   : > { %943 = vmatpush.msra.mxu3 %v923_v52  ;;  %991 = vmatpush.msrb.mxu0 %v961_v14  ;;  %v1742_v52 = vld [vmem:[%s2594_s3 + $0x100] sm:$0xff] }
 0x334   : > { %v1865_v14 = vld [vmem:[%s2595_s4 + $0x6] ss:$0 sm:$0xff] }
 0x335   : > { %992 = vmatpush.msrb.mxu0 %v960_v15 }
 0x33a   : > { %1723 = vmatmul.msk.f32.vlgmr.msrb.gmra.mxu3 %vm610_vm5, %v707_v21 }
 0x3b5   : > { %v674_v23 = vpop.f32.mrf.mxu3 }
 0x3b6   : > { %1728 = vmatmul.msk.f32.vlgmr.msrb.gmra.mxu2 %vm610_vm5, %v674_v23 }
 0x3bd   : > { %v792_v24 = vpop.f32.mrf.mxu3 }
 0x3be   : > { %v795_v25 = vmul.f32 0.25, %v792_v24 }
 0x3c0   : > { %v796_v26 = vadd.f32 %v2230_v1, %v795_v25 }
 0x3c2   : > { %v797_v27 = vsel %vm642_vm6, %v796_v26, -inf }
 0x3c3   : > { %798 = vmax.xlane.f32.xlu2 %v797_v27 }
 0x436   : > { %v799_v28 = vpop.xlane.xlu2 %798 }
 0x437   : > { %v800_v29 = vsub.f32 %v796_v26, %v799_v28  ;;  %v1862_v28 = vld [vmem:[%s2597_s6 + $0x3] ss:$0 sm:$0xff] }
 0x439   : > { %v801_v30 = vmul.f32 1.442695, %v800_v29  ;;  %v877_v40 = vpop.f32.mrf.mxu2 }
 0x43b   : > { %1886 = vpow2.f32 %v801_v30 }
 0x441   : > { %v1887_v31 = vpop.eup %1886 }
 0x442   : > { %v803_v32 = vsel %vm642_vm6, %v1887_v31, 0.0 }
 0x443   : > { %804 = vadd.xlane.f32.xlu2 %v803_v32 }
 0x4b6   : > { %v805_v34 = vpop.xlane.xlu2 %804 }
 0x4b7   : > { %1888 = vrcp.f32 %v805_v34 }
 0x4bd   : > { %v1889_v35 = vpop.eup %1888 }
 0x4be   : > { %v807_v36 = vmul.f32 %v1889_v35, %v1887_v31 }
 0x4c0   : > { %1724 = vmatmul.msk.f32.vlgmr.msra.gmra.mxu0 %vm642_vm6, %v807_v36 }
 0x53d   : > { %v828_v38 = vpop.f32.mrf.mxu0 }
 0x53e   : > { %1727 = vmatmul.msk.f32.vlgmr.msra.gmra.mxu1 %vm610_vm5, %v828_v38  ;;  %v1739_v38 = vld [vmem:[%s2594_s3 + $0xd8] sm:$0xff] }
 0x53f   : > { %1057 = vmatpush.msrb.mxu1 %v1739_v38 }
 0x5bb   : > { %v854_v41 = vpop.f32.mrf.mxu1 }
 0x5bc   : > { %v878_v42 = vadd.f32 %v877_v40, %v854_v41  ;;  %v1751_v40 = vld [vmem:[%s2594_s3 + $0x158] sm:$0xff] }
 0x5bd   : > { %v1768_v41 = vld [vmem:[%s2594_s3 + $0x138] sm:$0xff] }
 0x5be   : > { %v884_v43 = vadd.f32 %v1858_v39, %v878_v42  ;;  %v1745_v39 = vld [vmem:[%s2594_s3 + $0x118] sm:$0xff]  ;;  %1242 = vmatpush.msra.mxu0 %v1768_v41  ;;  %v1738_v42 = vld [vmem:[%s2594_s3 + $0xd0] sm:$0xff] }
 0x5bf   : > { %1087 = vmatpush.msra.mxu2 %v1745_v39  ;;  %1058 = vmatpush.msrb.mxu1 %v1738_v42  ;;  %v1758_v39 = vld [vmem:[%s2596_s5 + $0x28] sm:$0xff] }
 0x5c0   : > { %v885_v44 = vadd.f32 %v884_v43, %v2184_v48  ;;  %v922_v48 = vld [vmem:[%s2598_s7 + $0x10] sm:$0xff] }
 0x5c1   : > { %944 = vmatpush.msra.mxu3 %v922_v48  ;;  %v1744_v43 = vld [vmem:[%s2594_s3 + $0x110] sm:$0xff]  ;;  %v1748_v48 = vld [vmem:[%s2594_s3 + $0x140] sm:$0xff] }
 0x5c2   : > { %v890_v45 = vsel %vm481_vm0, %v885_v44, 0.0  ;;  %1088 = vmatpush.msra.mxu2 %v1744_v43  ;;  %v1869_v43 = vld [vmem:[%s2595_s4 + $0x7] ss:$0 sm:$0xff] }
 0x5c3   : > { %891 = vadd.xlane.f32.xlu0 %v890_v45  ;;  %945 = vmatpush.msra.mxu3 %v921_v53  ;;  %v1767_v45 = vld [vmem:[%s2594_s3 + $0x130] sm:$0xff]  ;;  %v1765_v53 = vld [vmem:[%s2594_s3 + $0x120] sm:$0xff] }
 0x5c4   : > { %1243 = vmatpush.msra.mxu0 %v1767_v45 }
 0x5c5   : > { %946 = vmatpush.msra.mxu3 %v920_v54  ;;  %v1762_v54 = vld [vmem:[%s2594_s3 + $0xf8] sm:$0xff] }
 0x5c7   : > { %1117 = vmatpush.msrb.mxu3 %v1751_v40 }
 0x636   : > { %v892_v46 = vpop.xlane.xlu0 %891 }
 0x637   : > { %v893_v47 = vmul.f32 %v892_v46, %v2113_v8  ;;  %v1737_v46 = vld [vmem:[%s2594_s3 + $0xc8] sm:$0xff] }
 0x638   : > { %1059 = vmatpush.msrb.mxu1 %v1737_v46  ;;  %v1757_v46 = vld [vmem:[%s2596_s5 + $0x20] sm:$0xff] }
 0x639   : > { %v894_v49 = vsub.f32 %v885_v44, %v893_v47  ;;  %v1750_v44 = vld [vmem:[%s2594_s3 + $0x150] sm:$0xff]  ;;  %v1743_v47 = vld [vmem:[%s2594_s3 + $0x108] sm:$0xff] }
 0x63a   : > { %1118 = vmatpush.msrb.mxu3 %v1750_v44  ;;  %1089 = vmatpush.msra.mxu2 %v1743_v47 }
 0x63b   : > { %v895_v50 = vmul.f32 %v894_v49, %v894_v49 }
 0x63c   : > { %1090 = vmatpush.msra.mxu2 %v1742_v52 }
 0x63d   : > { %v896_v51 = vsel %vm481_vm0, %v895_v50, 0.0  ;;  %v1766_v50 = vld [vmem:[%s2594_s3 + $0x128] sm:$0xff] }
 0x63e   : > { %897 = vadd.xlane.f32.xlu1 %v896_v51  ;;  %v1736_v51 = vld [vmem:[%s2594_s3 + $0xc0] sm:$0xff]  ;;  %1244 = vmatpush.msra.mxu0 %v1766_v50 }
 0x63f   : > { %1060 = vmatpush.msrb.mxu1 %v1736_v51 }
 0x640   : > { %1245 = vmatpush.msra.mxu0 %v1765_v53 }
 0x6b1   : > { %v898_v55 = vpop.xlane.xlu1 %897 }
 0x6b2   : > { %v899_v56 = vmul.f32 %v898_v55, %v2113_v8  ;;  %v1761_v55 = vld [vmem:[%s2594_s3 + $0xf0] sm:$0xff] }
 0x6b4   : > { %v900_v57 = vadd.f32 1e-12, %v899_v56 }
 0x6b6   : > { %1890 = vrsqrt.f32 %v900_v57  ;;  %vm907_vm8 = vweird.f32 %v900_v57 }
 0x6bc   : > { %v1891_v58 = vpop.eup %1890 }
 0x6bd   : > { %v902_v59 = vmul.f32 %v1891_v58, %v900_v57  ;;  %vm908_vm7 = vweird.f32 %v1891_v58  ;;  %v1760_v57 = vld [vmem:[%s2594_s3 + $0xe8] sm:$0xff] }
 0x6be   : > { %vm909_vm9 = vmor %vm907_vm8, %vm908_vm7 }
 0x6bf   : > { %v903_v60 = vmul.f32 %v1891_v58, %v902_v59  ;;  %v1759_v59 = vld [vmem:[%s2594_s3 + $0xe0] sm:$0xff] }
 0x6c1   : > { %v904_v61 = vmul.f32 0.5, %v903_v60 }
 0x6c3   : > { %v905_v62 = vsub.f32 1.5, %v904_v61 }
 0x6c5   : > { %v906_v63 = vmul.f32 %v1891_v58, %v905_v62 }
 0x6c7   : > { %v910_v2 = vsel %vm909_vm9, %v1891_v58, %v906_v63 }
 0x6c8   : > { %v911_v3 = vmul.f32 %v910_v2, %v894_v49  ;;  %v1749_v49 = vld [vmem:[%s2594_s3 + $0x148] sm:$0xff] }
 0x6c9   : > { %1119 = vmatpush.msrb.mxu3 %v1749_v49 }
 0x6ca   : > { %v915_v5 = vmul.f32 %v1859_v0, %v911_v3 }
 0x6cb   : > { %1120 = vmatpush.msrb.mxu3 %v1748_v48 }
 0x6cc   : > { %v919_v6 = vadd.f32 %v1860_v4, %v915_v5  ;;  %v1863_v4 = vld [vmem:[%s2597_s6 + $0x4] ss:$0 sm:$0xff] }
 0x6ce   : > { %1731 = vmatmul.msk.f32.vlgmr.msra.gmra.mxu3 %vm481_vm0, %v919_v6 }
 0x6cf   : > { %1212 = vmatpush.msra.mxu3 %v1762_v54 }
 0x6d1   : > { %1213 = vmatpush.msra.mxu3 %v1761_v55 }
 0x6d3   : > { %1214 = vmatpush.msra.mxu3 %v1760_v57  ;;  %v1781_v57 = vld [vmem:[%s2596_s5 + $0x38] sm:$0xff] }
 0x6d5   : > { %1215 = vmatpush.msra.mxu3 %v1759_v59 }
 0x751   : > { %v948_v17 = vpop.f32.mrf.mxu3 }
 0x752   : > { %v949_v18 = vadd.f32 %v1861_v16, %v948_v17 }
 0x754   : > { %v952_v19 = vmul.f32 0.044715, %v949_v18  ;;  %v951_v25 = vmul.f32 0.5, %v949_v18 }
 0x756   : > { %v953_v20 = vmul.f32 %v952_v19, %v949_v18 }
 0x758   : > { %v954_v21 = vmul.f32 %v953_v20, %v949_v18  ;;  %v1774_v20 = vld [vmem:[%s2594_s3 + $0x178] sm:$0xff] }
 0x75a   : > { %v955_v22 = vadd.f32 %v954_v21, %v949_v18 }
 0x75c   : > { %v956_v23 = vmul.f32 0.7978846, %v955_v22 }
 0x75e   : > { %1892 = vtanh.f32 %v956_v23 }
 0x764   : > { %v1893_v24 = vpop.eup %1892 }
 0x765   : > { %v958_v26 = vadd.f32 1.0, %v1893_v24  ;;  %v1773_v24 = vld [vmem:[%s2594_s3 + $0x170] sm:$0xff] }
 0x767   : > { %v959_v27 = vmul.f32 %v958_v26, %v951_v25  ;;  %v1772_v25 = vld [vmem:[%s2594_s3 + $0x168] sm:$0xff]  ;;  %v1771_v26 = vld [vmem:[%s2594_s3 + $0x160] sm:$0xff] }
 0x769   : > { %1733 = vmatmul.msk.f32.vlgmr.msrb.gmra.mxu0 %vm973_vm10, %v959_v27 }
 0x76a   : > { %1362 = vmatpush.msrb.mxu0 %v1781_v57 }
 0x7e6   : > { %v994_v29 = vpop.f32.mrf.mxu0 }
 0x7e7   : > { %v995_v30 = vadd.f32 %v1862_v28, %v994_v29 }
 0x7e9   : > { %v997_v31 = vadd.f32 %v995_v30, %v919_v6  ;;  %v1864_v6 = vld [vmem:[%s2597_s6 + $0x5] ss:$0 sm:$0xff] }
 0x7eb   : > { %v1002_v32 = vsel %vm481_vm0, %v997_v31, 0.0 }
 0x7ec   : > { %1003 = vadd.xlane.f32.xlu2 %v1002_v32 }
 0x85f   : > { %v1004_v33 = vpop.xlane.xlu2 %1003 }
 0x860   : > { %v1005_v34 = vmul.f32 %v1004_v33, %v2113_v8 }
 0x862   : > { %v1006_v35 = vsub.f32 %v997_v31, %v1005_v34  ;;  %v1870_v31 = vld [vmem:[%s2595_s4 + $0xb] ss:$0 sm:$0xff] }
 0x864   : > { %v1007_v36 = vmul.f32 %v1006_v35, %v1006_v35 }
 0x866   : > { %v1008_v37 = vsel %vm481_vm0, %v1007_v36, 0.0 }
 0x867   : > { %1009 = vadd.xlane.f32.xlu0 %v1008_v37 }
 0x8da   : > { %v1010_v56 = vpop.xlane.xlu0 %1009 }
 0x8db   : > { %v1011_v58 = vmul.f32 %v1010_v56, %v2113_v8 }
 0x8dd   : > { %v1012_v60 = vadd.f32 1e-12, %v1011_v58 }
 0x8df   : > { %1894 = vrsqrt.f32 %v1012_v60  ;;  %vm1019_vm12 = vweird.f32 %v1012_v60 }
 0x8e5   : > { %v1895_v61 = vpop.eup %1894 }
 0x8e6   : > { %v1014_v62 = vmul.f32 %v1895_v61, %v1012_v60  ;;  %vm1020_vm11 = vweird.f32 %v1895_v61  ;;  %v1780_v60 = vld [vmem:[%s2596_s5 + $0x30] sm:$0xff] }
 0x8e7   : > { %vm1021_vm13 = vmor %vm1019_vm12, %vm1020_vm11  ;;  %1363 = vmatpush.msrb.mxu0 %v1780_v60  ;;  %v1549_v60 = vld [vmem:[%s2601_s10 + $0x18] sm:$0xff] }
 0x8e8   : > { %v1015_v63 = vmul.f32 %v1895_v61, %v1014_v62  ;;  %v1871_v62 = vld [vmem:[%s2597_s6 + $0x6] ss:$0 sm:$0xff] }
 0x8ea   : > { %v1016_v0 = vmul.f32 0.5, %v1015_v63 }
 0x8ec   : > { %v1017_v2 = vsub.f32 1.5, %v1016_v0 }
 0x8ee   : > { %v1018_v3 = vmul.f32 %v1895_v61, %v1017_v2 }
 0x8f0   : > { %v1022_v5 = vsel %vm1021_vm13, %v1895_v61, %v1018_v3 }
 0x8f1   : > { %v1023_v7 = vmul.f32 %v1022_v5, %v1006_v35 }
 0x8f3   : > { %v1027_v9 = vmul.f32 %v1863_v4, %v1023_v7 }
 0x8f5   : > { %v2389_v10 = vadd.f32 %v1864_v6, %v1027_v9 }
 0x8f7   : > { %1741 = vmatmul.msk.f32.vlgmr.msrb.gmra.mxu1 %vm481_vm0, %v2389_v10  ;;  %1747 = vmatmul.msk.f32.vlgmr.msra.gmra.mxu2 %vm481_vm0, %v2389_v10 }
 0x8f8   : > { %1753 = vmatmul.msk.f32.vlgmr.msrb.gmra.mxu3 %vm481_vm0, %v2389_v10  ;;  %1770 = vmatmul.msk.f32.vlgmr.msra.gmra.mxu0 %vm481_vm0, %v2389_v10 }
 0x8f9   : > { %1566 = vmatpush.msra.mxu0 %v1549_v60 }
 0x900   : > { %1764 = vmatmul.msk.f32.vlgmr.msra.gmra.mxu3 %vm481_vm0, %v2389_v10 }
 0x974   : > { %v1062_v17 = vpop.f32.mrf.mxu1 }
 0x975   : > { %v1247_v15 = vpop.f32.mrf.mxu0  ;;  %v1063_v23 = vadd.f32 %v1865_v14, %v1062_v17  ;;  %v1788_v14 = vld [vmem:[%s2598_s7 + $0x28] sm:$0xff] }
 0x976   : > { %v1248_v22 = vadd.f32 %v1866_v13, %v1247_v15  ;;  %v1790_v13 = vld [vmem:[%s2598_s7 + $0x38] sm:$0xff]  ;;  %v1787_v15 = vld [vmem:[%s2598_s7 + $0x20] sm:$0xff] }
 0x97a   : > { %v1092_v16 = vpop.f32.mrf.mxu2 }
 0x97b   : > { %v1093_v18 = vadd.f32 %v1867_v11, %v1092_v16  ;;  %v1122_v19 = vpop.f32.mrf.mxu3 }
 0x97c   : > { %v1123_v21 = vadd.f32 %v1868_v12, %v1122_v19 }
 0x97d   : > { %1754 = vmatpush.xpose.msk.msra.mxu1 %vm610_vm5, %v1093_v18 }
 0x97e   : > { %1182 = vmatpush.msrb.mxu2 %v1123_v21 }
 0x980   : > { %1777 = vmatpush.xpose.msk.msra.mxu2 %vm610_vm5, %v1248_v22  ;;  %1755 = vmatmul.msk.f32.vlgmr.msra.gmra.mxu1 %vm610_vm5, %v1063_v23 }
 0x981   : > { %1272 = vmatpush.msrb.mxu1 %v1774_v20 }
 0x983   : > { %1273 = vmatpush.msrb.mxu1 %v1773_v24  ;;  %v1217_v44 = vpop.f32.mrf.mxu3 }
 0x984   : > { %v1218_v45 = vadd.f32 %v1869_v43, %v1217_v44 }
 0x985   : > { %1274 = vmatpush.msrb.mxu1 %v1772_v25  ;;  %v1872_v25 = vld [vmem:[%s2597_s6 + $0x7] ss:$0 sm:$0xff] }
 0x987   : > { %1275 = vmatpush.msrb.mxu1 %v1771_v26 }
 0x988   : > { %1776 = vmatmul.msk.f32.vlgmr.msrb.gmra.mxu1 %vm481_vm0, %v2389_v10 }
 0x989   : > { %1385 = vmatpush.msra.mxu1 %v1758_v39  ;;  %v1874_v39 = vld [vmem:[%s2599_s8 + $0x1] ss:$0 sm:$0xff] }
 0x98b   : > { %1386 = vmatpush.msra.mxu1 %v1757_v46 }
 0x9fd   : > { %v1148_v27 = vpop.f32.mrf.mxu1 }
 0x9fe   : > { %v1151_v28 = vmul.f32 0.25, %v1148_v27 }
 0xa00   : > { %v1152_v29 = vadd.f32 %v2230_v1, %v1151_v28  ;;  %v1873_v28 = vld [vmem:[%s2597_s6 + $0x8] ss:$0 sm:$0xff] }
 0xa02   : > { %v1153_v30 = vsel %vm642_vm6, %v1152_v29, -inf }
 0xa03   : > { %1154 = vmax.xlane.f32.xlu1 %v1153_v30 }
 0xa05   : > { %v1277_v32 = vpop.f32.mrf.mxu1 }
 0xa06   : > { %v1278_v33 = vadd.f32 %v1870_v31, %v1277_v32  ;;  %v1800_v31 = vld [vmem:[%s2600_s9 + $0x78] sm:$0xff]  ;;  %v1799_v32 = vld [vmem:[%s2600_s9 + $0x70] sm:$0xff] }
 0xa08   : > { %1337 = vmatpush.msrb.mxu3 %v1278_v33  ;;  %v1798_v33 = vld [vmem:[%s2600_s9 + $0x68] sm:$0xff] }
 0xa0a   : > { %1499 = vmatpush.msra.mxu3 %v1800_v31 }
 0xa0c   : > { %1500 = vmatpush.msra.mxu3 %v1799_v32 }
 0xa0e   : > { %1501 = vmatpush.msra.mxu3 %v1798_v33 }
 0xa76   : > { %v1155_v34 = vpop.xlane.xlu1 %1154 }
 0xa77   : > { %v1156_v35 = vsub.f32 %v1152_v29, %v1155_v34  ;;  %v1797_v34 = vld [vmem:[%s2600_s9 + $0x60] sm:$0xff] }
 0xa78   : > { %1502 = vmatpush.msra.mxu3 %v1797_v34 }
 0xa79   : > { %v1157_v36 = vmul.f32 1.442695, %v1156_v35  ;;  %v1796_v35 = vld [vmem:[%s2600_s9 + $0x58] sm:$0xff] }
 0xa7a   : > { %1503 = vmatpush.msra.mxu3 %v1796_v35 }
 0xa7b   : > { %1896 = vpow2.f32 %v1157_v36  ;;  %v1795_v36 = vld [vmem:[%s2600_s9 + $0x50] sm:$0xff] }
 0xa7c   : > { %1504 = vmatpush.msra.mxu3 %v1795_v36 }
 0xa81   : > { %v1897_v37 = vpop.eup %1896 }
 0xa82   : > { %v1159_v38 = vsel %vm642_vm6, %v1897_v37, 0.0 }
 0xa83   : > { %1160 = vadd.xlane.f32.xlu2 %v1159_v38  ;;  %v1793_v38 = vld [vmem:[%s2600_s9 + $0x40] sm:$0xff] }
 0xaf6   : > { %v1161_v40 = vpop.xlane.xlu2 %1160 }
 0xaf7   : > { %1898 = vrcp.f32 %v1161_v40 }
 0xafd   : > { %v1899_v41 = vpop.eup %1898 }
 0xafe   : > { %v1163_v42 = vmul.f32 %v1899_v41, %v1897_v37  ;;  %v1794_v37 = vld [vmem:[%s2600_s9 + $0x48] sm:$0xff] }
 0xaff   : > { %1505 = vmatpush.msra.mxu3 %v1794_v37 }
 0xb00   : > { %1756 = vmatmul.msk.f32.vlgmr.msrb.gmra.mxu2 %vm642_vm6, %v1163_v42 }
 0xb01   : > { %1457 = vmatpush.msrb.mxu2 %v1790_v13  ;;  %1506 = vmatpush.msra.mxu3 %v1793_v38 }
 0xb08   : > { %1778 = vmatmul.msk.f32.vlgmr.msra.gmra.mxu2 %vm610_vm5, %v1218_v45 }
 0xb83   : > { %v1184_v47 = vpop.f32.mrf.mxu2 }
 0xb84   : > { %1783 = vmatmul.msk.f32.vlgmr.msra.gmra.mxu1 %vm610_vm5, %v1184_v47 }
 0xb8b   : > { %v1303_v49 = vpop.f32.mrf.mxu2 }
 0xb8c   : > { %v1306_v50 = vmul.f32 0.25, %v1303_v49 }
 0xb8e   : > { %v1307_v51 = vadd.f32 %v2230_v1, %v1306_v50 }
 0xb90   : > { %v1308_v52 = vsel %vm642_vm6, %v1307_v51, -inf }
 0xb91   : > { %1309 = vmax.xlane.f32.xlu0 %v1308_v52  ;;  %v1875_v52 = vld [vmem:[%s2597_s6 + $0x9] ss:$0 sm:$0xff] }
 0xc01   : > { %v1388_v63 = vpop.f32.mrf.mxu1 }
 0xc04   : > { %v1310_v48 = vpop.xlane.xlu0 %1309 }
 0xc05   : > { %v1311_v53 = vsub.f32 %v1307_v51, %v1310_v48 }
 0xc07   : > { %v1312_v54 = vmul.f32 1.442695, %v1311_v53 }
 0xc09   : > { %1900 = vpow2.f32 %v1312_v54 }
 0xc0f   : > { %v1901_v55 = vpop.eup %1900 }
 0xc10   : > { %v1314_v56 = vsel %vm642_vm6, %v1901_v55, 0.0 }
 0xc11   : > { %1315 = vadd.xlane.f32.xlu1 %v1314_v56 }
 0xc84   : > { %v1316_v58 = vpop.xlane.xlu1 %1315 }
 0xc85   : > { %1902 = vrcp.f32 %v1316_v58 }
 0xc8b   : > { %v1903_v59 = vpop.eup %1902 }
 0xc8c   : > { %v1318_v1 = vmul.f32 %v1903_v59, %v1901_v55 }
 0xc8e   : > { %1779 = vmatmul.msk.f32.vlgmr.msrb.gmra.mxu3 %vm642_vm6, %v1318_v1 }
 0xd11   : > { %v1339_v61 = vpop.f32.mrf.mxu3 }
 0xd12   : > { %1782 = vmatmul.msk.f32.vlgmr.msrb.gmra.mxu0 %vm610_vm5, %v1339_v61  ;;  %v1548_v61 = vld [vmem:[%s2601_s10 + $0x10] sm:$0xff]  ;;  %vm1603_vm5 = vcmask 16384  }
 0xd13   : > { %1567 = vmatpush.msra.mxu0 %v1548_v61 }
 0xd8f   : > { %v1365_v0 = vpop.f32.mrf.mxu0 }
 0xd90   : > { %v1389_v2 = vadd.f32 %v1388_v63, %v1365_v0  ;;  %v1546_v63 = vld [vmem:[%s2601_s10] sm:$0xff] }
 0xd92   : > { %v1396_v3 = vadd.f32 %v1871_v62, %v1389_v2  ;;  %v1547_v62 = vld [vmem:[%s2601_s10 + $0x8] sm:$0xff] }
 0xd93   : > { %1568 = vmatpush.msra.mxu0 %v1547_v62 }
 0xd94   : > { %v1397_v4 = vadd.f32 %v1396_v3, %v2389_v10  ;;  %v1789_v10 = vld [vmem:[%s2598_s7 + $0x30] sm:$0xff] }
 0xd95   : > { %1458 = vmatpush.msrb.mxu2 %v1789_v10  ;;  %1569 = vmatpush.msra.mxu0 %v1546_v63 }
 0xd96   : > { %v1402_v5 = vsel %vm481_vm0, %v1397_v4, 0.0 }
 0xd97   : > { %1403 = vadd.xlane.f32.xlu2 %v1402_v5  ;;  %1459 = vmatpush.msrb.mxu2 %v1788_v14 }
 0xd99   : > { %1460 = vmatpush.msrb.mxu2 %v1787_v15 }
 0xe0a   : > { %v1404_v6 = vpop.xlane.xlu2 %1403 }
 0xe0b   : > { %v1405_v7 = vmul.f32 %v1404_v6, %v2113_v8 }
 0xe0d   : > { %v1406_v9 = vsub.f32 %v1397_v4, %v1405_v7 }
 0xe0f   : > { %v1407_v11 = vmul.f32 %v1406_v9, %v1406_v9 }
 0xe11   : > { %v1408_v12 = vsel %vm481_vm0, %v1407_v11, 0.0 }
 0xe12   : > { %1409 = vadd.xlane.f32.xlu0 %v1408_v12  ;;  %v1876_v12 = vld [vmem:[%s2597_s6 + $0xa] ss:$0 sm:$0xff] }
 0xe85   : > { %v1410_v16 = vpop.xlane.xlu0 %1409 }
 0xe86   : > { %v1411_v17 = vmul.f32 %v1410_v16, %v2113_v8  ;;  %v1578_v16 = vld [vmem:[%s2603_s12 + $0x18] sm:$0xff] }
 0xe87   : > { %1595 = vmatpush.msrb.mxu1 %v1578_v16 }
 0xe88   : > { %v1412_v18 = vadd.f32 1e-12, %v1411_v17  ;;  %v1577_v17 = vld [vmem:[%s2603_s12 + $0x10] sm:$0xff] }
 0xe89   : > { %1596 = vmatpush.msrb.mxu1 %v1577_v17 }
 0xe8a   : > { %1904 = vrsqrt.f32 %v1412_v18  ;;  %vm1419_vm15 = vweird.f32 %v1412_v18 }
 0xe90   : > { %v1905_v19 = vpop.eup %1904 }
 0xe91   : > { %v1414_v20 = vmul.f32 %v1905_v19, %v1412_v18  ;;  %vm1420_vm14 = vweird.f32 %v1905_v19  ;;  %v1576_v18 = vld [vmem:[%s2603_s12 + $0x8] sm:$0xff] }
 0xe92   : > { %vm1421_vm1 = vmor %vm1419_vm15, %vm1420_vm14  ;;  %1597 = vmatpush.msrb.mxu1 %v1576_v18 }
 0xe93   : > { %v1415_v21 = vmul.f32 %v1905_v19, %v1414_v20  ;;  %v1550_v20 = vld [vmem:[%s2602_s11] sm:$0x1] }
 0xe95   : > { %v1416_v22 = vmul.f32 0.5, %v1415_v21 }
 0xe97   : > { %v1417_v23 = vsub.f32 1.5, %v1416_v22 }
 0xe99   : > { %v1418_v24 = vmul.f32 %v1905_v19, %v1417_v23 }
 0xe9b   : > { %v1422_v26 = vsel %vm1421_vm1, %v1905_v19, %v1418_v24  ;;  %v1575_v19 = vld [vmem:[%s2603_s12] sm:$0xff] }
 0xe9c   : > { %v1423_v27 = vmul.f32 %v1422_v26, %v1406_v9  ;;  %1598 = vmatpush.msrb.mxu1 %v1575_v19  ;;  %v1579_v24 = vld [vmem:[%s2604_s13] sm:$0x1] }
 0xe9e   : > { %v1427_v29 = vmul.f32 %v1872_v25, %v1423_v27 }
 0xea0   : > { %v1431_v30 = vadd.f32 %v1873_v28, %v1427_v29 }
 0xea2   : > { %1792 = vmatmul.msk.f32.vlgmr.msrb.gmra.mxu2 %vm481_vm0, %v1431_v30 }
 0xf25   : > { %v1462_v40 = vpop.f32.mrf.mxu2 }
 0xf26   : > { %v1463_v41 = vadd.f32 %v1874_v39, %v1462_v40 }
 0xf28   : > { %v1466_v42 = vmul.f32 0.044715, %v1463_v41  ;;  %v1465_v49 = vmul.f32 0.5, %v1463_v41 }
 0xf2a   : > { %v1467_v43 = vmul.f32 %v1466_v42, %v1463_v41 }
 0xf2c   : > { %v1468_v44 = vmul.f32 %v1467_v43, %v1463_v41 }
 0xf2e   : > { %v1469_v45 = vadd.f32 %v1468_v44, %v1463_v41 }
 0xf30   : > { %v1470_v46 = vmul.f32 0.7978846, %v1469_v45 }
 0xf32   : > { %1906 = vtanh.f32 %v1470_v46 }
 0xf38   : > { %v1907_v47 = vpop.eup %1906 }
 0xf39   : > { %v1472_v50 = vadd.f32 1.0, %v1907_v47 }
 0xf3b   : > { %v1473_v51 = vmul.f32 %v1472_v50, %v1465_v49 }
 0xf3d   : > { %1802 = vmatmul.msk.f32.vlgmr.msra.gmra.mxu3 %vm973_vm10, %v1473_v51 }
 0xfc0   : > { %v1508_v48 = vpop.f32.mrf.mxu3 }
 0xfc1   : > { %v1509_v53 = vadd.f32 %v1875_v52, %v1508_v48 }
 0xfc3   : > { %v1511_v54 = vadd.f32 %v1509_v53, %v1431_v30 }
 0xfc5   : > { %v1516_v55 = vsel %vm481_vm0, %v1511_v54, 0.0 }
 0xfc6   : > { %1517 = vadd.xlane.f32.xlu1 %v1516_v55 }
0x1039   : > { %v1518_v56 = vpop.xlane.xlu1 %1517 }
0x103a   : > { %v1519_v57 = vmul.f32 %v1518_v56, %v2113_v8 }
0x103c   : > { %v1520_v58 = vsub.f32 %v1511_v54, %v1519_v57 }
0x103e   : > { %v1521_v59 = vmul.f32 %v1520_v58, %v1520_v58 }
0x1040   : > { %v1522_v1 = vsel %vm481_vm0, %v1521_v59, 0.0 }
0x1041   : > { %1523 = vadd.xlane.f32.xlu2 %v1522_v1 }
0x10b4   : > { %v1524_v0 = vpop.xlane.xlu2 %1523 }
0x10b5   : > { %v1525_v2 = vmul.f32 %v1524_v0, %v2113_v8  ;;  %v1877_v8 = vld [vmem:[%s2597_s6 + $0xb] ss:$0 sm:$0xff] }
0x10b7   : > { %v1526_v3 = vadd.f32 1e-12, %v1525_v2 }
0x10b9   : > { %1908 = vrsqrt.f32 %v1526_v3  ;;  %vm1533_vm3 = vweird.f32 %v1526_v3 }
0x10bf   : > { %v1909_v4 = vpop.eup %1908 }
0x10c0   : > { %v1528_v5 = vmul.f32 %v1909_v4, %v1526_v3  ;;  %vm1534_vm2 = vweird.f32 %v1909_v4 }
0x10c1   : > { %vm1535_vm4 = vmor %vm1533_vm3, %vm1534_vm2 }
0x10c2   : > { %v1529_v6 = vmul.f32 %v1909_v4, %v1528_v5 }
0x10c4   : > { %v1530_v7 = vmul.f32 0.5, %v1529_v6 }
0x10c6   : > { %v1531_v9 = vsub.f32 1.5, %v1530_v7 }
0x10c8   : > { %v1532_v11 = vmul.f32 %v1909_v4, %v1531_v9 }
0x10ca   : > { %v1536_v13 = vsel %vm1535_vm4, %v1909_v4, %v1532_v11 }
0x10cb   : > { %v1537_v10 = vmul.f32 %v1536_v13, %v1520_v58 }
0x10cd   : > { %v1541_v14 = vmul.f32 %v1876_v12, %v1537_v10 }
0x10cf   : > { %v1545_v15 = vadd.f32 %v1877_v8, %v1541_v14 }
0x10d1   : > { %1805 = vmatmul.msk.f32.vlgmr.msra.gmra.mxu0 %vm481_vm0, %v1545_v15 }
0x114e   : > { %v1571_v21 = vpop.f32.mrf.mxu0 }
0x114f   : > { %v1572_v22 = vadd.f32 %v1571_v21, %v1550_v20 }
0x1151   : > { %1910 = vtanh.f32 %v1572_v22 }
0x1157   : > { %v1911_v23 = vpop.eup %1910 }
0x1158   : > { %1806 = vmatmul.msk.f32.vlgmr.msrb.gmra.mxu1 %vm481_vm0, %v1911_v23 }
0x11d5   : > { %v1600_v25 = vpop.f32.mrf.mxu1 }
0x11d6   : > { %v1601_v26 = vadd.f32 %v1600_v25, %v1579_v24 }
0x11d8   : > { %1604 = vst.msk [vmem:[%s468_s0] sm:$0x1] %vm1603_vm5, %v1601_v26 }
0x11d9   : > { %1939 = shalt.err (!%p1936_p3)
}
0x11da   : > { %1809 = dma.vmem_to_hbm [thread:$0]  (%p2090_p5), %s1617_s18, 16, %s1619_s15, %s1606_s19  }
0x11db PF: > { %p1815_p4 = scmp.ge.s32.totalorder %s1974_s16, 2  ;;  %s1630_s26 = sand.u32 1, %s1962_s29  }
0x11dc   : > { %s1631_s21 = scalar_lea.sflag [#allocation3], %s1630_s26 }
0x11dd   : > { %p1812_p7 = pnand %p1815_p4, %p2094_p6 }
0x11df   : > { %p1813_p8 = pneg %p1812_p7 }
0x11e1   : > { %1957 = dma.done.wait (%p1813_p8), %s1631_s21, 16  }
0x11e2   : > { %1959 = vsyncadd (%p1813_p8), %s1631_s21, 4294967280  ;;  %s2619_s16 = sld [smem:[#allocation6_spill]]  ;;  %s2622_s29 = smov %s1966_s30 }
0x11e3   : > { %s2620_s1 = sld [smem:[#allocation5_spill]] }
0x11e4   : > { %s2621_s15 = sld [smem:[#allocation7_spill]] }
0x11e8   : > { %p24_p9 = scmp.ge.s32.totalorder %s2619_s16, 4  }
0x11e9   : > { %s2623_s30 = smov %s2620_s1 }
0x11ea   :  { %26 = sbr.rel (!%p24_p9) target bundleno = 6 (0x6), region = 154 }
0x11ef   :  { %1636 = vsyncpa [#allocation3], 1 }
0x11f0   :  { %1638 = vsyncpa [#allocation3 + $0x1], 1 }

</bundles_post_ra>
